<compile_context>
chip_gen: v7x
topology: tpu7x:2x2x1
jax: 0.10.0
libtpu: 0.0.40
codegen_flags: <defaults>
</compile_context>

<pallas_src>
import math
import functools

import numpy as np
import jax
import jax.numpy as jnp
from jax.experimental import pallas as pl
from jax.experimental.pallas import tpu as pltpu


def _layernorm(x, gamma, beta, eps=1e-5):
    mean = jnp.mean(x, axis=-1, keepdims=True)
    var = jnp.mean((x - mean) ** 2, axis=-1, keepdims=True)
    return (x - mean) * jax.lax.rsqrt(var + eps) * gamma + beta


def transformer_layer_kernel(
    # inputs
    x_full_ref, x_tile_ref,
    wq_ref, bq_ref, wkv_ref, bkv_ref,
    wo_ref, bo_ref, g1_ref, b1_ref,
    wi_ref, bi_ref, wd_ref, bd_ref, g2_ref, b2_ref,
    # outputs
    out_ref, scores_ref,
    # scratch
    kh_s, vh_s, qh_s, ctx_s,
    *, num_heads, head_size, compute_dtype):
    H, hs = num_heads, head_size
    AH = H * hs
    cdt = compute_dtype
    qi = pl.program_id(1)

    # ---- K/V projection: once per batch element, resident across q tiles ----
    @pl.when(qi == 0)
    def _fill_kv():
        xk = x_full_ref[0].astype(cdt)                                 # (L, Hm)
        kv = jnp.dot(xk, wkv_ref[...],
                     preferred_element_type=jnp.float32) + bkv_ref[...]  # (L, 2*AH) f32
        for h in range(H):                                             # layout plumbing only
            kh_s[h] = kv[:, h * hs:(h + 1) * hs].astype(cdt)
            vh_s[h] = kv[:, AH + h * hs:AH + (h + 1) * hs].astype(cdt)

    # ---- Q projection for this query tile (scale /4.0 folded into Q) ----
    x_tile = x_tile_ref[0]                                             # (TQ, Hm) f32
    q = jnp.dot(x_tile.astype(cdt), wq_ref[...],
                preferred_element_type=jnp.float32) + bq_ref[...]      # (TQ, AH) f32
    q = q * 0.25   # == the module's hard-coded `attention_scores /= 4.0`
    for h in range(H):
        qh_s[h] = q[:, h * hs:(h + 1) * hs].astype(cdt)

    # ---- Attention: batched over heads on the MXU ----
    qh = qh_s[...]                                                     # (H, TQ, hs)
    kh = kh_s[...]                                                     # (H, L,  hs)
    vh = vh_s[...]                                                     # (H, L,  hs)
    s = jnp.einsum('hqd,hkd->hqk', qh, kh,
                   preferred_element_type=jnp.float32)                 # (H, TQ, L) f32
    scores_ref[0] = s                                                  # pre-softmax scores

    m = jnp.max(s, axis=-1, keepdims=True)
    p = jnp.exp(s - m)
    p = p * pl.reciprocal(jnp.sum(p, axis=-1, keepdims=True), approx=True)
    # TODO(synk): attention_mask / structure_matrix branches and dropout not
    # implemented (None / eval-mode in the reference forward).
    ctx_h = jnp.einsum('hqk,hkd->hqd', p.astype(cdt), vh,
                       preferred_element_type=jnp.float32)             # (H, TQ, hs) f32
    for h in range(H):
        ctx_s[:, h * hs:(h + 1) * hs] = ctx_h[h].astype(cdt)

    # ---- Attention output dense + residual + LayerNorm ----
    attn_dense = jnp.dot(ctx_s[...], wo_ref[...],
                         preferred_element_type=jnp.float32) + bo_ref[...]
    attn_out = _layernorm(attn_dense + x_tile, g1_ref[...], b1_ref[...])

    # ---- Feed-forward: intermediate (exact erf GELU) + dense + residual + LN ----
    inter = jnp.dot(attn_out.astype(cdt), wi_ref[...],
                    preferred_element_type=jnp.float32) + bi_ref[...]
    inter = 0.5 * inter * (1.0 + jax.lax.erf(inter * (1.0 / math.sqrt(2.0))))
    ffn = jnp.dot(inter.astype(cdt), wd_ref[...],
                  preferred_element_type=jnp.float32) + bd_ref[...]
    out_ref[0] = _layernorm(ffn + attn_out, g2_ref[...], b2_ref[...]).astype(out_ref.dtype)


def transformer_layer(x, params, num_heads, head_size, *,
                      q_block=256, compute_dtype=jnp.bfloat16):
    B, L, Hm = x.shape
    AH = num_heads * head_size
    TQ = L if L <= q_block else q_block
    assert L % TQ == 0 and (TQ == L or TQ % 8 == 0), "q tile must divide L and be 8-aligned"
    QT = L // TQ

    f32 = jnp.float32
    # Matmul weights in bf16 (MXU-native, halves weight HBM/VMEM traffic);
    # biases / LayerNorm params stay f32.
    w_q = params['wq'].astype(compute_dtype)
    b_q = params['bq'].astype(f32)
    w_kv = jnp.concatenate([params['wk'], params['wv']], axis=1).astype(compute_dtype)
    b_kv = jnp.concatenate([params['bk'], params['bv']], axis=1).astype(f32)
    w_o = params['wo'].astype(compute_dtype)
    b_o = params['bo'].astype(f32)
    w_i = params['wi'].astype(compute_dtype)
    b_i = params['bi'].astype(f32)
    w_d = params['wd'].astype(compute_dtype)
    b_d = params['bd'].astype(f32)
    g1 = params['g1'].astype(f32)
    b1 = params['b1'].astype(f32)
    g2 = params['g2'].astype(f32)
    b2 = params['b2'].astype(f32)

    weights = [w_q, b_q, w_kv, b_kv, w_o, b_o, g1, b1, w_i, b_i, w_d, b_d, g2, b2]

    kernel = functools.partial(transformer_layer_kernel,
                               num_heads=num_heads, head_size=head_size,
                               compute_dtype=compute_dtype)

    def rep2d(arr):
        return pl.BlockSpec(arr.shape, lambda b, qi: (0, 0))

    in_specs = [
        pl.BlockSpec((1, L, Hm), lambda b, qi: (b, 0, 0)),    # full sequence (for K/V)
        pl.BlockSpec((1, TQ, Hm), lambda b, qi: (b, qi, 0)),  # query tile (+ residual)
    ] + [rep2d(w) for w in weights]

    out_shapes = (jax.ShapeDtypeStruct((B, L, Hm), jnp.float32),
                  jax.ShapeDtypeStruct((B, num_heads, L, L), jnp.float32))
    out_specs = [pl.BlockSpec((1, TQ, Hm), lambda b, qi: (b, qi, 0)),
                 pl.BlockSpec((1, num_heads, TQ, L), lambda b, qi: (b, 0, qi, 0))]

    scratch_shapes = [
        pltpu.VMEM((num_heads, L, head_size), compute_dtype),   # K, per head, full seq
        pltpu.VMEM((num_heads, L, head_size), compute_dtype),   # V, per head, full seq
        pltpu.VMEM((num_heads, TQ, head_size), compute_dtype),  # Q, per head, this tile
        pltpu.VMEM((TQ, AH), compute_dtype),                    # ctx tile
    ]

    return pl.pallas_call(
        kernel,
        out_shape=out_shapes,
        grid_spec=pltpu.PrefetchScalarGridSpec(
            num_scalar_prefetch=0,
            grid=(B, QT),
            in_specs=in_specs,
            out_specs=out_specs,
            scratch_shapes=scratch_shapes),
        compiler_params=pltpu.CompilerParams(
            # batch axis parallel (megacore / v7x 2-TC); q-tile axis arbitrary
            # because the K/V scratch is reused across q tiles of one batch elem.
            dimension_semantics=("parallel", "arbitrary"),
            vmem_limit_bytes=32 * 1024 * 1024),
    )(x, x, *weights)


def init_params(key, hidden_size, intermediate_size, num_heads, head_size):
    all_head = num_heads * head_size
    ks = jax.random.split(key, 12)

    def lin(k, fan_in, fan_out):
        # stored as (in, out) so kernel does y = x @ W + b (== PyTorch x @ W.T + b)
        bound = 1.0 / math.sqrt(fan_in)
        kw, kb = jax.random.split(k)
        w = jax.random.uniform(kw, (fan_in, fan_out), jnp.float32, -bound, bound)
        b = jax.random.uniform(kb, (1, fan_out), jnp.float32, -bound, bound)
        return w, b

    wq, bq = lin(ks[0], hidden_size, all_head)
    wk, bk = lin(ks[1], hidden_size, all_head)
    wv, bv = lin(ks[2], hidden_size, all_head)
    wo, bo = lin(ks[3], all_head, hidden_size)
    wi, bi = lin(ks[4], hidden_size, intermediate_size)
    wd, bd = lin(ks[5], intermediate_size, hidden_size)
    return dict(
        wq=wq, bq=bq, wk=wk, bk=bk, wv=wv, bv=bv,
        wo=wo, bo=bo,
        g1=jnp.ones((1, hidden_size), jnp.float32),
        b1=jnp.zeros((1, hidden_size), jnp.float32),
        wi=wi, bi=bi, wd=wd, bd=bd,
        g2=jnp.ones((1, hidden_size), jnp.float32),
        b2=jnp.zeros((1, hidden_size), jnp.float32),
    )


def reference_forward(x, p, num_heads, head_size):
    """Pure-JAX f32 reference matching the PyTorch forward (eval mode, no mask/structure)."""
    B, L, Hm = x.shape
    q = x @ p['wq'] + p['bq']
    k = x @ p['wk'] + p['bk']
    v = x @ p['wv'] + p['bv']

    def split(t):  # (B, L, AH) -> (B, H, L, Dh)
        return t.reshape(B, L, num_heads, head_size).transpose(0, 2, 1, 3)

    qh, kh, vh = split(q), split(k), split(v)
    scores = jnp.einsum('bhld,bhmd->bhlm', qh, kh) / 4.0
    probs = jax.nn.softmax(scores, axis=-1)
    ctx = jnp.einsum('bhlm,bhmd->bhld', probs, vh)
    ctx = ctx.transpose(0, 2, 1, 3).reshape(B, L, num_heads * head_size)

    def ln(t, g, b, eps=1e-5):
        m = jnp.mean(t, axis=-1, keepdims=True)
        var = jnp.mean((t - m) ** 2, axis=-1, keepdims=True)
        return (t - m) / jnp.sqrt(var + eps) * g + b

    attn_out = ln(ctx @ p['wo'] + p['bo'] + x, p['g1'], p['b1'])
    inter = attn_out @ p['wi'] + p['bi']
    inter = 0.5 * inter * (1.0 + jax.lax.erf(inter / jnp.sqrt(2.0)))
    out = ln(inter @ p['wd'] + p['bd'] + attn_out, p['g2'], p['b2'])
    return out, scores


if __name__ == "__main__":
    B = 2
    hidden_size = 32
    intermediate_size = 64
    num_heads = 4
    head_size = 8

    key = jax.random.PRNGKey(0)
    kx, kp, kx2 = jax.random.split(key, 3)
    params = init_params(kp, hidden_size, intermediate_size, num_heads, head_size)

    # kernel compute is bf16 (f32 accumulation / stats), reference is pure f32
    RTOL = 5e-2
    ATOL = 5e-2

    # --- test 1: tiny sequence (single q tile per batch element) ---
    L1 = 8
    x1 = jax.random.normal(kx, (B, L1, hidden_size), jnp.float32)
    out1, scores1 = transformer_layer(x1, params, num_heads, head_size)
    out1, scores1 = jax.block_until_ready((out1, scores1))
    ref_out1, ref_scores1 = reference_forward(x1, params, num_heads, head_size)
    np.testing.assert_allclose(np.asarray(out1), np.asarray(ref_out1), rtol=RTOL, atol=ATOL)
    np.testing.assert_allclose(np.asarray(scores1), np.asarray(ref_scores1), rtol=RTOL, atol=ATOL)

    # --- test 2: longer sequence, exercises the q-tiling + resident K/V path ---
    L2 = 256
    x2 = jax.random.normal(kx2, (B, L2, hidden_size), jnp.float32)
    out2, scores2 = transformer_layer(x2, params, num_heads, head_size, q_block=128)
    out2, scores2 = jax.block_until_ready((out2, scores2))
    ref_out2, ref_scores2 = reference_forward(x2, params, num_heads, head_size)
    np.testing.assert_allclose(np.asarray(out2), np.asarray(ref_out2), rtol=RTOL, atol=ATOL)
    np.testing.assert_allclose(np.asarray(scores2), np.asarray(ref_scores2), rtol=RTOL, atol=ATOL)

    print("KERNEL_OK")
</pallas_src>

<mosaic_0001>
module attributes {stable_mosaic.version = 11 : i64} {
  func.func @transformer_layer_kernel(%arg0: i32, %arg1: i32, %arg2: memref<1x8x32xf32, #tpu.memory_space<vmem>>, %arg3: memref<1x8x32xf32, #tpu.memory_space<vmem>>, %arg4: memref<32x32xbf16, #tpu.memory_space<vmem>>, %arg5: memref<1x32xf32, #tpu.memory_space<vmem>>, %arg6: memref<32x64xbf16, #tpu.memory_space<vmem>>, %arg7: memref<1x64xf32, #tpu.memory_space<vmem>>, %arg8: memref<32x32xbf16, #tpu.memory_space<vmem>>, %arg9: memref<1x32xf32, #tpu.memory_space<vmem>>, %arg10: memref<1x32xf32, #tpu.memory_space<vmem>>, %arg11: memref<1x32xf32, #tpu.memory_space<vmem>>, %arg12: memref<32x64xbf16, #tpu.memory_space<vmem>>, %arg13: memref<1x64xf32, #tpu.memory_space<vmem>>, %arg14: memref<64x32xbf16, #tpu.memory_space<vmem>>, %arg15: memref<1x32xf32, #tpu.memory_space<vmem>>, %arg16: memref<1x32xf32, #tpu.memory_space<vmem>>, %arg17: memref<1x32xf32, #tpu.memory_space<vmem>>, %arg18: memref<1x8x32xf32, #tpu.memory_space<vmem>>, %arg19: memref<1x4x8x8xf32, #tpu.memory_space<vmem>>, %arg20: memref<4x8x8xbf16, #tpu.memory_space<vmem>>, %arg21: memref<4x8x8xbf16, #tpu.memory_space<vmem>>, %arg22: memref<4x8x8xbf16, #tpu.memory_space<vmem>>, %arg23: memref<8x32xbf16, #tpu.memory_space<vmem>>) attributes {dimension_semantics = [#tpu.dimension_semantics<parallel>, #tpu.dimension_semantics<arbitrary>], iteration_bounds = array<i64: 2, 1>, scalar_prefetch = 0 : i64, scratch_operands = 4 : i64, tpu.core_type = #tpu.core_type<tc>, window_params = [{transform_indices = @transform_0, window_bounds = array<i64: 1, 8, 32>}, {transform_indices = @transform_1, window_bounds = array<i64: 1, 8, 32>}, {pipeline_mode = #tpu.pipeline_mode<synchronous>, transform_indices = @transform_2, window_bounds = array<i64: 32, 32>}, {pipeline_mode = #tpu.pipeline_mode<synchronous>, transform_indices = @transform_3, window_bounds = array<i64: 1, 32>}, {pipeline_mode = #tpu.pipeline_mode<synchronous>, transform_indices = @transform_4, window_bounds = array<i64: 32, 64>}, {pipeline_mode = #tpu.pipeline_mode<synchronous>, transform_indices = @transform_5, window_bounds = array<i64: 1, 64>}, {pipeline_mode = #tpu.pipeline_mode<synchronous>, transform_indices = @transform_6, window_bounds = array<i64: 32, 32>}, {pipeline_mode = #tpu.pipeline_mode<synchronous>, transform_indices = @transform_7, window_bounds = array<i64: 1, 32>}, {pipeline_mode = #tpu.pipeline_mode<synchronous>, transform_indices = @transform_8, window_bounds = array<i64: 1, 32>}, {pipeline_mode = #tpu.pipeline_mode<synchronous>, transform_indices = @transform_9, window_bounds = array<i64: 1, 32>}, {pipeline_mode = #tpu.pipeline_mode<synchronous>, transform_indices = @transform_10, window_bounds = array<i64: 32, 64>}, {pipeline_mode = #tpu.pipeline_mode<synchronous>, transform_indices = @transform_11, window_bounds = array<i64: 1, 64>}, {pipeline_mode = #tpu.pipeline_mode<synchronous>, transform_indices = @transform_12, window_bounds = array<i64: 64, 32>}, {pipeline_mode = #tpu.pipeline_mode<synchronous>, transform_indices = @transform_13, window_bounds = array<i64: 1, 32>}, {pipeline_mode = #tpu.pipeline_mode<synchronous>, transform_indices = @transform_14, window_bounds = array<i64: 1, 32>}, {pipeline_mode = #tpu.pipeline_mode<synchronous>, transform_indices = @transform_15, window_bounds = array<i64: 1, 32>}, {transform_indices = @transform_16, window_bounds = array<i64: 1, 8, 32>}, {transform_indices = @transform_17, window_bounds = array<i64: 1, 4, 8, 8>}]} {
    %c0_i32 = arith.constant 0 : i32
    %0 = arith.cmpi eq, %arg1, %c0_i32 : i32
    %1 = arith.extui %0 : i1 to i32
    %c0_i32_0 = arith.constant 0 : i32
    %2 = arith.cmpi ne, %1, %c0_i32_0 : i32
    scf.if %2 {
      %c0_80 = arith.constant 0 : index
      %c0_81 = arith.constant 0 : index
      %c0_82 = arith.constant 0 : index
      %147 = vector.load %arg2[%c0_80, %c0_81, %c0_82] : memref<1x8x32xf32, #tpu.memory_space<vmem>>, vector<1x8x32xf32>
      %148 = vector.shape_cast %147 : vector<1x8x32xf32> to vector<8x32xf32>
      %149 = arith.truncf %148 : vector<8x32xf32> to vector<8x32xbf16>
      %c0_83 = arith.constant 0 : index
      %c0_84 = arith.constant 0 : index
      %150 = vector.load %arg6[%c0_83, %c0_84] : memref<32x64xbf16, #tpu.memory_space<vmem>>, vector<32x64xbf16>
      %cst_85 = arith.constant dense<0.000000e+00> : vector<8x64xf32>
      %151 = tpu.matmul %149, %150, %cst_85 {dimension_numbers = #tpu.dot_dimension_numbers<[1], [0], [0], [1], [0, 0, 1, 1], [], []>} : vector<8x32xbf16>, vector<32x64xbf16>, vector<8x64xf32> -> vector<8x64xf32>
      %c0_86 = arith.constant 0 : index
      %c0_87 = arith.constant 0 : index
      %152 = vector.load %arg7[%c0_86, %c0_87] : memref<1x64xf32, #tpu.memory_space<vmem>>, vector<1x64xf32>
      %153 = vector.broadcast %152 : vector<1x64xf32> to vector<8x64xf32>
      %154 = arith.addf %151, %153 : vector<8x64xf32>
      %155 = vector.extract_strided_slice %154 {offsets = [0, 0], sizes = [8, 8], strides = [1, 1]} : vector<8x64xf32> to vector<8x8xf32>
      %156 = arith.truncf %155 : vector<8x8xf32> to vector<8x8xbf16>
      %c0_88 = arith.constant 0 : index
      %c0_89 = arith.constant 0 : index
      %c0_90 = arith.constant 0 : index
      %157 = vector.load %arg20[%c0_88, %c0_89, %c0_90] : memref<4x8x8xbf16, #tpu.memory_space<vmem>>, vector<1x8x8xbf16>
      %158 = vector.shape_cast %157 : vector<1x8x8xbf16> to vector<8x8xbf16>
      %159 = vector.shape_cast %156 : vector<8x8xbf16> to vector<1x8x8xbf16>
      tpu.vector_store %arg20[%c0_88, %c0_89, %c0_90], %159 {strides = array<i32>} : memref<4x8x8xbf16, #tpu.memory_space<vmem>>, vector<1x8x8xbf16>,
      %160 = vector.extract_strided_slice %154 {offsets = [0, 32], sizes = [8, 8], strides = [1, 1]} : vector<8x64xf32> to vector<8x8xf32>
      %161 = arith.truncf %160 : vector<8x8xf32> to vector<8x8xbf16>
      %c0_91 = arith.constant 0 : index
      %c0_92 = arith.constant 0 : index
      %c0_93 = arith.constant 0 : index
      %162 = vector.load %arg21[%c0_91, %c0_92, %c0_93] : memref<4x8x8xbf16, #tpu.memory_space<vmem>>, vector<1x8x8xbf16>
      %163 = vector.shape_cast %162 : vector<1x8x8xbf16> to vector<8x8xbf16>
      %164 = vector.shape_cast %161 : vector<8x8xbf16> to vector<1x8x8xbf16>
      tpu.vector_store %arg21[%c0_91, %c0_92, %c0_93], %164 {strides = array<i32>} : memref<4x8x8xbf16, #tpu.memory_space<vmem>>, vector<1x8x8xbf16>,
      %165 = vector.extract_strided_slice %154 {offsets = [0, 8], sizes = [8, 8], strides = [1, 1]} : vector<8x64xf32> to vector<8x8xf32>
      %166 = arith.truncf %165 : vector<8x8xf32> to vector<8x8xbf16>
      %c1_94 = arith.constant 1 : index
      %c0_95 = arith.constant 0 : index
      %c0_96 = arith.constant 0 : index
      %167 = vector.load %arg20[%c1_94, %c0_95, %c0_96] : memref<4x8x8xbf16, #tpu.memory_space<vmem>>, vector<1x8x8xbf16>
      %168 = vector.shape_cast %167 : vector<1x8x8xbf16> to vector<8x8xbf16>
      %169 = vector.shape_cast %166 : vector<8x8xbf16> to vector<1x8x8xbf16>
      tpu.vector_store %arg20[%c1_94, %c0_95, %c0_96], %169 {strides = array<i32>} : memref<4x8x8xbf16, #tpu.memory_space<vmem>>, vector<1x8x8xbf16>,
      %170 = vector.extract_strided_slice %154 {offsets = [0, 40], sizes = [8, 8], strides = [1, 1]} : vector<8x64xf32> to vector<8x8xf32>
      %171 = arith.truncf %170 : vector<8x8xf32> to vector<8x8xbf16>
      %c1_97 = arith.constant 1 : index
      %c0_98 = arith.constant 0 : index
      %c0_99 = arith.constant 0 : index
      %172 = vector.load %arg21[%c1_97, %c0_98, %c0_99] : memref<4x8x8xbf16, #tpu.memory_space<vmem>>, vector<1x8x8xbf16>
      %173 = vector.shape_cast %172 : vector<1x8x8xbf16> to vector<8x8xbf16>
      %174 = vector.shape_cast %171 : vector<8x8xbf16> to vector<1x8x8xbf16>
      tpu.vector_store %arg21[%c1_97, %c0_98, %c0_99], %174 {strides = array<i32>} : memref<4x8x8xbf16, #tpu.memory_space<vmem>>, vector<1x8x8xbf16>,
      %175 = vector.extract_strided_slice %154 {offsets = [0, 16], sizes = [8, 8], strides = [1, 1]} : vector<8x64xf32> to vector<8x8xf32>
      %176 = arith.truncf %175 : vector<8x8xf32> to vector<8x8xbf16>
      %c2_100 = arith.constant 2 : index
      %c0_101 = arith.constant 0 : index
      %c0_102 = arith.constant 0 : index
      %177 = vector.load %arg20[%c2_100, %c0_101, %c0_102] : memref<4x8x8xbf16, #tpu.memory_space<vmem>>, vector<1x8x8xbf16>
      %178 = vector.shape_cast %177 : vector<1x8x8xbf16> to vector<8x8xbf16>
      %179 = vector.shape_cast %176 : vector<8x8xbf16> to vector<1x8x8xbf16>
      tpu.vector_store %arg20[%c2_100, %c0_101, %c0_102], %179 {strides = array<i32>} : memref<4x8x8xbf16, #tpu.memory_space<vmem>>, vector<1x8x8xbf16>,
      %180 = vector.extract_strided_slice %154 {offsets = [0, 48], sizes = [8, 8], strides = [1, 1]} : vector<8x64xf32> to vector<8x8xf32>
      %181 = arith.truncf %180 : vector<8x8xf32> to vector<8x8xbf16>
      %c2_103 = arith.constant 2 : index
      %c0_104 = arith.constant 0 : index
      %c0_105 = arith.constant 0 : index
      %182 = vector.load %arg21[%c2_103, %c0_104, %c0_105] : memref<4x8x8xbf16, #tpu.memory_space<vmem>>, vector<1x8x8xbf16>
      %183 = vector.shape_cast %182 : vector<1x8x8xbf16> to vector<8x8xbf16>
      %184 = vector.shape_cast %181 : vector<8x8xbf16> to vector<1x8x8xbf16>
      tpu.vector_store %arg21[%c2_103, %c0_104, %c0_105], %184 {strides = array<i32>} : memref<4x8x8xbf16, #tpu.memory_space<vmem>>, vector<1x8x8xbf16>,
      %185 = vector.extract_strided_slice %154 {offsets = [0, 24], sizes = [8, 8], strides = [1, 1]} : vector<8x64xf32> to vector<8x8xf32>
      %186 = arith.truncf %185 : vector<8x8xf32> to vector<8x8xbf16>
      %c3_106 = arith.constant 3 : index
      %c0_107 = arith.constant 0 : index
      %c0_108 = arith.constant 0 : index
      %187 = vector.load %arg20[%c3_106, %c0_107, %c0_108] : memref<4x8x8xbf16, #tpu.memory_space<vmem>>, vector<1x8x8xbf16>
      %188 = vector.shape_cast %187 : vector<1x8x8xbf16> to vector<8x8xbf16>
      %189 = vector.shape_cast %186 : vector<8x8xbf16> to vector<1x8x8xbf16>
      tpu.vector_store %arg20[%c3_106, %c0_107, %c0_108], %189 {strides = array<i32>} : memref<4x8x8xbf16, #tpu.memory_space<vmem>>, vector<1x8x8xbf16>,
      %190 = vector.extract_strided_slice %154 {offsets = [0, 56], sizes = [8, 8], strides = [1, 1]} : vector<8x64xf32> to vector<8x8xf32>
      %191 = arith.truncf %190 : vector<8x8xf32> to vector<8x8xbf16>
      %c3_109 = arith.constant 3 : index
      %c0_110 = arith.constant 0 : index
      %c0_111 = arith.constant 0 : index
      %192 = vector.load %arg21[%c3_109, %c0_110, %c0_111] : memref<4x8x8xbf16, #tpu.memory_space<vmem>>, vector<1x8x8xbf16>
      %193 = vector.shape_cast %192 : vector<1x8x8xbf16> to vector<8x8xbf16>
      %194 = vector.shape_cast %191 : vector<8x8xbf16> to vector<1x8x8xbf16>
      tpu.vector_store %arg21[%c3_109, %c0_110, %c0_111], %194 {strides = array<i32>} : memref<4x8x8xbf16, #tpu.memory_space<vmem>>, vector<1x8x8xbf16>,
    } else {
    }
    %c0 = arith.constant 0 : index
    %c0_1 = arith.constant 0 : index
    %c0_2 = arith.constant 0 : index
    %3 = vector.load %arg3[%c0, %c0_1, %c0_2] : memref<1x8x32xf32, #tpu.memory_space<vmem>>, vector<1x8x32xf32>
    %4 = vector.shape_cast %3 : vector<1x8x32xf32> to vector<8x32xf32>
    %5 = arith.truncf %4 : vector<8x32xf32> to vector<8x32xbf16>
    %c0_3 = arith.constant 0 : index
    %c0_4 = arith.constant 0 : index
    %6 = vector.load %arg4[%c0_3, %c0_4] : memref<32x32xbf16, #tpu.memory_space<vmem>>, vector<32x32xbf16>
    %cst = arith.constant dense<0.000000e+00> : vector<8x32xf32>
    %7 = tpu.matmul %5, %6, %cst {dimension_numbers = #tpu.dot_dimension_numbers<[1], [0], [0], [1], [0, 0, 1, 1], [], []>} : vector<8x32xbf16>, vector<32x32xbf16>, vector<8x32xf32> -> vector<8x32xf32>
    %c0_5 = arith.constant 0 : index
    %c0_6 = arith.constant 0 : index
    %8 = vector.load %arg5[%c0_5, %c0_6] : memref<1x32xf32, #tpu.memory_space<vmem>>, vector<1x32xf32>
    %9 = vector.broadcast %8 : vector<1x32xf32> to vector<8x32xf32>
    %10 = arith.addf %7, %9 : vector<8x32xf32>
    %cst_7 = arith.constant 2.500000e-01 : f32
    %11 = vector.broadcast %cst_7 : f32 to vector<8x32xf32>
    %12 = arith.mulf %10, %11 : vector<8x32xf32>
    %13 = vector.extract_strided_slice %12 {offsets = [0, 0], sizes = [8, 8], strides = [1, 1]} : vector<8x32xf32> to vector<8x8xf32>
    %14 = arith.truncf %13 : vector<8x8xf32> to vector<8x8xbf16>
    %c0_8 = arith.constant 0 : index
    %c0_9 = arith.constant 0 : index
    %c0_10 = arith.constant 0 : index
    %15 = vector.load %arg22[%c0_8, %c0_9, %c0_10] : memref<4x8x8xbf16, #tpu.memory_space<vmem>>, vector<1x8x8xbf16>
    %16 = vector.shape_cast %15 : vector<1x8x8xbf16> to vector<8x8xbf16>
    %17 = vector.shape_cast %14 : vector<8x8xbf16> to vector<1x8x8xbf16>
    tpu.vector_store %arg22[%c0_8, %c0_9, %c0_10], %17 {strides = array<i32>} : memref<4x8x8xbf16, #tpu.memory_space<vmem>>, vector<1x8x8xbf16>,
    %18 = vector.extract_strided_slice %12 {offsets = [0, 8], sizes = [8, 8], strides = [1, 1]} : vector<8x32xf32> to vector<8x8xf32>
    %19 = arith.truncf %18 : vector<8x8xf32> to vector<8x8xbf16>
    %c1 = arith.constant 1 : index
    %c0_11 = arith.constant 0 : index
    %c0_12 = arith.constant 0 : index
    %20 = vector.load %arg22[%c1, %c0_11, %c0_12] : memref<4x8x8xbf16, #tpu.memory_space<vmem>>, vector<1x8x8xbf16>
    %21 = vector.shape_cast %20 : vector<1x8x8xbf16> to vector<8x8xbf16>
    %22 = vector.shape_cast %19 : vector<8x8xbf16> to vector<1x8x8xbf16>
    tpu.vector_store %arg22[%c1, %c0_11, %c0_12], %22 {strides = array<i32>} : memref<4x8x8xbf16, #tpu.memory_space<vmem>>, vector<1x8x8xbf16>,
    %23 = vector.extract_strided_slice %12 {offsets = [0, 16], sizes = [8, 8], strides = [1, 1]} : vector<8x32xf32> to vector<8x8xf32>
    %24 = arith.truncf %23 : vector<8x8xf32> to vector<8x8xbf16>
    %c2 = arith.constant 2 : index
    %c0_13 = arith.constant 0 : index
    %c0_14 = arith.constant 0 : index
    %25 = vector.load %arg22[%c2, %c0_13, %c0_14] : memref<4x8x8xbf16, #tpu.memory_space<vmem>>, vector<1x8x8xbf16>
    %26 = vector.shape_cast %25 : vector<1x8x8xbf16> to vector<8x8xbf16>
    %27 = vector.shape_cast %24 : vector<8x8xbf16> to vector<1x8x8xbf16>
    tpu.vector_store %arg22[%c2, %c0_13, %c0_14], %27 {strides = array<i32>} : memref<4x8x8xbf16, #tpu.memory_space<vmem>>, vector<1x8x8xbf16>,
    %28 = vector.extract_strided_slice %12 {offsets = [0, 24], sizes = [8, 8], strides = [1, 1]} : vector<8x32xf32> to vector<8x8xf32>
    %29 = arith.truncf %28 : vector<8x8xf32> to vector<8x8xbf16>
    %c3 = arith.constant 3 : index
    %c0_15 = arith.constant 0 : index
    %c0_16 = arith.constant 0 : index
    %30 = vector.load %arg22[%c3, %c0_15, %c0_16] : memref<4x8x8xbf16, #tpu.memory_space<vmem>>, vector<1x8x8xbf16>
    %31 = vector.shape_cast %30 : vector<1x8x8xbf16> to vector<8x8xbf16>
    %32 = vector.shape_cast %29 : vector<8x8xbf16> to vector<1x8x8xbf16>
    tpu.vector_store %arg22[%c3, %c0_15, %c0_16], %32 {strides = array<i32>} : memref<4x8x8xbf16, #tpu.memory_space<vmem>>, vector<1x8x8xbf16>,
    %c0_17 = arith.constant 0 : index
    %c0_18 = arith.constant 0 : index
    %c0_19 = arith.constant 0 : index
    %33 = vector.load %arg22[%c0_17, %c0_18, %c0_19] : memref<4x8x8xbf16, #tpu.memory_space<vmem>>, vector<4x8x8xbf16>
    %c0_20 = arith.constant 0 : index
    %c0_21 = arith.constant 0 : index
    %c0_22 = arith.constant 0 : index
    %34 = vector.load %arg20[%c0_20, %c0_21, %c0_22] : memref<4x8x8xbf16, #tpu.memory_space<vmem>>, vector<4x8x8xbf16>
    %c0_23 = arith.constant 0 : index
    %c0_24 = arith.constant 0 : index
    %c0_25 = arith.constant 0 : index
    %35 = vector.load %arg21[%c0_23, %c0_24, %c0_25] : memref<4x8x8xbf16, #tpu.memory_space<vmem>>, vector<4x8x8xbf16>
    "tpu.trace_start"() <{level = 10 : i32, message = "hqd,hkd->hqk"}> : () -> ()
    %cst_26 = arith.constant dense<0.000000e+00> : vector<4x8x8xf32>
    %36 = tpu.matmul %33, %34, %cst_26 {dimension_numbers = #tpu.dot_dimension_numbers<[2], [2], [1], [1], [0, 0, 0, 1, 1, 1], [0], [0]>} : vector<4x8x8xbf16>, vector<4x8x8xbf16>, vector<4x8x8xf32> -> vector<4x8x8xf32>
    "tpu.trace_stop"() : () -> ()
    %c0_27 = arith.constant 0 : index
    %c0_28 = arith.constant 0 : index
    %c0_29 = arith.constant 0 : index
    %c0_30 = arith.constant 0 : index
    %37 = vector.load %arg19[%c0_27, %c0_28, %c0_29, %c0_30] : memref<1x4x8x8xf32, #tpu.memory_space<vmem>>, vector<1x4x8x8xf32>
    %38 = vector.shape_cast %37 : vector<1x4x8x8xf32> to vector<4x8x8xf32>
    %39 = vector.shape_cast %36 : vector<4x8x8xf32> to vector<1x4x8x8xf32>
    tpu.vector_store %arg19[%c0_27, %c0_28, %c0_29, %c0_30], %39 {strides = array<i32>} : memref<1x4x8x8xf32, #tpu.memory_space<vmem>>, vector<1x4x8x8xf32>,
    %cst_31 = arith.constant dense<0xFF800000> : vector<4x8xf32>
    %40 = vector.multi_reduction <maximumf>, %36, %cst_31 [2] : vector<4x8x8xf32> to vector<4x8xf32>
    %41 = vector.shape_cast %40 : vector<4x8xf32> to vector<4x8x1xf32>
    %42 = vector.broadcast %41 : vector<4x8x1xf32> to vector<4x8x8xf32>
    %43 = arith.subf %36, %42 : vector<4x8x8xf32>
    %44 = math.exp %43 : vector<4x8x8xf32>
    %cst_32 = arith.constant dense<0.000000e+00> : vector<4x8xf32>
    %45 = vector.multi_reduction <add>, %44, %cst_32 [2] : vector<4x8x8xf32> to vector<4x8xf32>
    %46 = vector.shape_cast %45 : vector<4x8xf32> to vector<4x8x1xf32>
    %47 = tpu.reciprocal %46 {approx = true} : vector<4x8x1xf32> -> vector<4x8x1xf32>
    %48 = vector.broadcast %47 : vector<4x8x1xf32> to vector<4x8x8xf32>
    %49 = arith.mulf %44, %48 : vector<4x8x8xf32>
    %50 = arith.truncf %49 : vector<4x8x8xf32> to vector<4x8x8xbf16>
    "tpu.trace_start"() <{level = 10 : i32, message = "hqk,hkd->hqd"}> : () -> ()
    %cst_33 = arith.constant dense<0.000000e+00> : vector<4x8x8xf32>
    %51 = tpu.matmul %50, %35, %cst_33 {dimension_numbers = #tpu.dot_dimension_numbers<[2], [1], [1], [2], [0, 0, 0, 1, 1, 2], [0], [0]>} : vector<4x8x8xbf16>, vector<4x8x8xbf16>, vector<4x8x8xf32> -> vector<4x8x8xf32>
    "tpu.trace_stop"() : () -> ()
    %52 = vector.extract_strided_slice %51 {offsets = [0, 0, 0], sizes = [1, 8, 8], strides = [1, 1, 1]} : vector<4x8x8xf32> to vector<1x8x8xf32>
    %53 = vector.shape_cast %52 : vector<1x8x8xf32> to vector<8x8xf32>
    %54 = arith.truncf %53 : vector<8x8xf32> to vector<8x8xbf16>
    %c0_34 = arith.constant 0 : index
    %c0_35 = arith.constant 0 : index
    %55 = vector.load %arg23[%c0_34, %c0_35] : memref<8x32xbf16, #tpu.memory_space<vmem>>, vector<8x8xbf16>
    tpu.vector_store %arg23[%c0_34, %c0_35], %54 {strides = array<i32>} : memref<8x32xbf16, #tpu.memory_space<vmem>>, vector<8x8xbf16>,
    %56 = vector.extract_strided_slice %51 {offsets = [1, 0, 0], sizes = [1, 8, 8], strides = [1, 1, 1]} : vector<4x8x8xf32> to vector<1x8x8xf32>
    %57 = vector.shape_cast %56 : vector<1x8x8xf32> to vector<8x8xf32>
    %58 = arith.truncf %57 : vector<8x8xf32> to vector<8x8xbf16>
    %c0_36 = arith.constant 0 : index
    %c8 = arith.constant 8 : index
    %59 = vector.load %arg23[%c0_36, %c8] : memref<8x32xbf16, #tpu.memory_space<vmem>>, vector<8x8xbf16>
    tpu.vector_store %arg23[%c0_36, %c8], %58 {strides = array<i32>} : memref<8x32xbf16, #tpu.memory_space<vmem>>, vector<8x8xbf16>,
    %60 = vector.extract_strided_slice %51 {offsets = [2, 0, 0], sizes = [1, 8, 8], strides = [1, 1, 1]} : vector<4x8x8xf32> to vector<1x8x8xf32>
    %61 = vector.shape_cast %60 : vector<1x8x8xf32> to vector<8x8xf32>
    %62 = arith.truncf %61 : vector<8x8xf32> to vector<8x8xbf16>
    %c0_37 = arith.constant 0 : index
    %c16 = arith.constant 16 : index
    %63 = vector.load %arg23[%c0_37, %c16] : memref<8x32xbf16, #tpu.memory_space<vmem>>, vector<8x8xbf16>
    tpu.vector_store %arg23[%c0_37, %c16], %62 {strides = array<i32>} : memref<8x32xbf16, #tpu.memory_space<vmem>>, vector<8x8xbf16>,
    %64 = vector.extract_strided_slice %51 {offsets = [3, 0, 0], sizes = [1, 8, 8], strides = [1, 1, 1]} : vector<4x8x8xf32> to vector<1x8x8xf32>
    %65 = vector.shape_cast %64 : vector<1x8x8xf32> to vector<8x8xf32>
    %66 = arith.truncf %65 : vector<8x8xf32> to vector<8x8xbf16>
    %c0_38 = arith.constant 0 : index
    %c24 = arith.constant 24 : index
    %67 = vector.load %arg23[%c0_38, %c24] : memref<8x32xbf16, #tpu.memory_space<vmem>>, vector<8x8xbf16>
    tpu.vector_store %arg23[%c0_38, %c24], %66 {strides = array<i32>} : memref<8x32xbf16, #tpu.memory_space<vmem>>, vector<8x8xbf16>,
    %c0_39 = arith.constant 0 : index
    %c0_40 = arith.constant 0 : index
    %68 = vector.load %arg23[%c0_39, %c0_40] : memref<8x32xbf16, #tpu.memory_space<vmem>>, vector<8x32xbf16>
    %c0_41 = arith.constant 0 : index
    %c0_42 = arith.constant 0 : index
    %69 = vector.load %arg8[%c0_41, %c0_42] : memref<32x32xbf16, #tpu.memory_space<vmem>>, vector<32x32xbf16>
    %cst_43 = arith.constant dense<0.000000e+00> : vector<8x32xf32>
    %70 = tpu.matmul %68, %69, %cst_43 {dimension_numbers = #tpu.dot_dimension_numbers<[1], [0], [0], [1], [0, 0, 1, 1], [], []>} : vector<8x32xbf16>, vector<32x32xbf16>, vector<8x32xf32> -> vector<8x32xf32>
    %c0_44 = arith.constant 0 : index
    %c0_45 = arith.constant 0 : index
    %71 = vector.load %arg9[%c0_44, %c0_45] : memref<1x32xf32, #tpu.memory_space<vmem>>, vector<1x32xf32>
    %72 = vector.broadcast %71 : vector<1x32xf32> to vector<8x32xf32>
    %73 = arith.addf %70, %72 : vector<8x32xf32>
    %74 = arith.addf %73, %4 : vector<8x32xf32>
    %c0_46 = arith.constant 0 : index
    %c0_47 = arith.constant 0 : index
    %75 = vector.load %arg10[%c0_46, %c0_47] : memref<1x32xf32, #tpu.memory_space<vmem>>, vector<1x32xf32>
    %c0_48 = arith.constant 0 : index
    %c0_49 = arith.constant 0 : index
    %76 = vector.load %arg11[%c0_48, %c0_49] : memref<1x32xf32, #tpu.memory_space<vmem>>, vector<1x32xf32>
    %cst_50 = arith.constant dense<0.000000e+00> : vector<8xf32>
    %77 = vector.multi_reduction <add>, %74, %cst_50 [1] : vector<8x32xf32> to vector<8xf32>
    %78 = vector.shape_cast %77 : vector<8xf32> to vector<8x1xf32>
    %cst_51 = arith.constant 3.200000e+01 : f32
    %79 = vector.broadcast %cst_51 : f32 to vector<8x1xf32>
    %80 = arith.divf %78, %79 : vector<8x1xf32>
    %81 = vector.broadcast %80 : vector<8x1xf32> to vector<8x32xf32>
    %82 = arith.subf %74, %81 : vector<8x32xf32>
    %83 = arith.mulf %82, %82 : vector<8x32xf32>
    %cst_52 = arith.constant dense<0.000000e+00> : vector<8xf32>
    %84 = vector.multi_reduction <add>, %83, %cst_52 [1] : vector<8x32xf32> to vector<8xf32>
    %85 = vector.shape_cast %84 : vector<8xf32> to vector<8x1xf32>
    %cst_53 = arith.constant 3.200000e+01 : f32
    %86 = vector.broadcast %cst_53 : f32 to vector<8x1xf32>
    %87 = arith.divf %85, %86 : vector<8x1xf32>
    %88 = vector.broadcast %80 : vector<8x1xf32> to vector<8x32xf32>
    %89 = arith.subf %74, %88 : vector<8x32xf32>
    %cst_54 = arith.constant 9.99999974E-6 : f32
    %90 = vector.broadcast %cst_54 : f32 to vector<8x1xf32>
    %91 = arith.addf %87, %90 : vector<8x1xf32>
    %92 = math.rsqrt %91 : vector<8x1xf32>
    %93 = vector.broadcast %92 : vector<8x1xf32> to vector<8x32xf32>
    %94 = arith.mulf %89, %93 : vector<8x32xf32>
    %95 = vector.broadcast %75 : vector<1x32xf32> to vector<8x32xf32>
    %96 = arith.mulf %94, %95 : vector<8x32xf32>
    %97 = vector.broadcast %76 : vector<1x32xf32> to vector<8x32xf32>
    %98 = arith.addf %96, %97 : vector<8x32xf32>
    %99 = arith.truncf %98 : vector<8x32xf32> to vector<8x32xbf16>
    %c0_55 = arith.constant 0 : index
    %c0_56 = arith.constant 0 : index
    %100 = vector.load %arg12[%c0_55, %c0_56] : memref<32x64xbf16, #tpu.memory_space<vmem>>, vector<32x64xbf16>
    %cst_57 = arith.constant dense<0.000000e+00> : vector<8x64xf32>
    %101 = tpu.matmul %99, %100, %cst_57 {dimension_numbers = #tpu.dot_dimension_numbers<[1], [0], [0], [1], [0, 0, 1, 1], [], []>} : vector<8x32xbf16>, vector<32x64xbf16>, vector<8x64xf32> -> vector<8x64xf32>
    %c0_58 = arith.constant 0 : index
    %c0_59 = arith.constant 0 : index
    %102 = vector.load %arg13[%c0_58, %c0_59] : memref<1x64xf32, #tpu.memory_space<vmem>>, vector<1x64xf32>
    %103 = vector.broadcast %102 : vector<1x64xf32> to vector<8x64xf32>
    %104 = arith.addf %101, %103 : vector<8x64xf32>
    %cst_60 = arith.constant 5.000000e-01 : f32
    %105 = vector.broadcast %cst_60 : f32 to vector<8x64xf32>
    %106 = arith.mulf %105, %104 : vector<8x64xf32>
    %cst_61 = arith.constant 0.707106769 : f32
    %107 = vector.broadcast %cst_61 : f32 to vector<8x64xf32>
    %108 = arith.mulf %104, %107 : vector<8x64xf32>
    %109 = math.erf %108 : vector<8x64xf32>
    %cst_62 = arith.constant 1.000000e+00 : f32
    %110 = vector.broadcast %cst_62 : f32 to vector<8x64xf32>
    %111 = arith.addf %110, %109 : vector<8x64xf32>
    %112 = arith.mulf %106, %111 : vector<8x64xf32>
    %113 = arith.truncf %112 : vector<8x64xf32> to vector<8x64xbf16>
    %c0_63 = arith.constant 0 : index
    %c0_64 = arith.constant 0 : index
    %114 = vector.load %arg14[%c0_63, %c0_64] : memref<64x32xbf16, #tpu.memory_space<vmem>>, vector<64x32xbf16>
    %cst_65 = arith.constant dense<0.000000e+00> : vector<8x32xf32>
    %115 = tpu.matmul %113, %114, %cst_65 {dimension_numbers = #tpu.dot_dimension_numbers<[1], [0], [0], [1], [0, 0, 1, 1], [], []>} : vector<8x64xbf16>, vector<64x32xbf16>, vector<8x32xf32> -> vector<8x32xf32>
    %c0_66 = arith.constant 0 : index
    %c0_67 = arith.constant 0 : index
    %116 = vector.load %arg15[%c0_66, %c0_67] : memref<1x32xf32, #tpu.memory_space<vmem>>, vector<1x32xf32>
    %117 = vector.broadcast %116 : vector<1x32xf32> to vector<8x32xf32>
    %118 = arith.addf %115, %117 : vector<8x32xf32>
    %119 = arith.addf %118, %98 : vector<8x32xf32>
    %c0_68 = arith.constant 0 : index
    %c0_69 = arith.constant 0 : index
    %120 = vector.load %arg16[%c0_68, %c0_69] : memref<1x32xf32, #tpu.memory_space<vmem>>, vector<1x32xf32>
    %c0_70 = arith.constant 0 : index
    %c0_71 = arith.constant 0 : index
    %121 = vector.load %arg17[%c0_70, %c0_71] : memref<1x32xf32, #tpu.memory_space<vmem>>, vector<1x32xf32>
    %cst_72 = arith.constant dense<0.000000e+00> : vector<8xf32>
    %122 = vector.multi_reduction <add>, %119, %cst_72 [1] : vector<8x32xf32> to vector<8xf32>
    %123 = vector.shape_cast %122 : vector<8xf32> to vector<8x1xf32>
    %cst_73 = arith.constant 3.200000e+01 : f32
    %124 = vector.broadcast %cst_73 : f32 to vector<8x1xf32>
    %125 = arith.divf %123, %124 : vector<8x1xf32>
    %126 = vector.broadcast %125 : vector<8x1xf32> to vector<8x32xf32>
    %127 = arith.subf %119, %126 : vector<8x32xf32>
    %128 = arith.mulf %127, %127 : vector<8x32xf32>
    %cst_74 = arith.constant dense<0.000000e+00> : vector<8xf32>
    %129 = vector.multi_reduction <add>, %128, %cst_74 [1] : vector<8x32xf32> to vector<8xf32>
    %130 = vector.shape_cast %129 : vector<8xf32> to vector<8x1xf32>
    %cst_75 = arith.constant 3.200000e+01 : f32
    %131 = vector.broadcast %cst_75 : f32 to vector<8x1xf32>
    %132 = arith.divf %130, %131 : vector<8x1xf32>
    %133 = vector.broadcast %125 : vector<8x1xf32> to vector<8x32xf32>
    %134 = arith.subf %119, %133 : vector<8x32xf32>
    %cst_76 = arith.constant 9.99999974E-6 : f32
    %135 = vector.broadcast %cst_76 : f32 to vector<8x1xf32>
    %136 = arith.addf %132, %135 : vector<8x1xf32>
    %137 = math.rsqrt %136 : vector<8x1xf32>
    %138 = vector.broadcast %137 : vector<8x1xf32> to vector<8x32xf32>
    %139 = arith.mulf %134, %138 : vector<8x32xf32>
    %140 = vector.broadcast %120 : vector<1x32xf32> to vector<8x32xf32>
    %141 = arith.mulf %139, %140 : vector<8x32xf32>
    %142 = vector.broadcast %121 : vector<1x32xf32> to vector<8x32xf32>
    %143 = arith.addf %141, %142 : vector<8x32xf32>
    %c0_77 = arith.constant 0 : index
    %c0_78 = arith.constant 0 : index
    %c0_79 = arith.constant 0 : index
    %144 = vector.load %arg18[%c0_77, %c0_78, %c0_79] : memref<1x8x32xf32, #tpu.memory_space<vmem>>, vector<1x8x32xf32>
    %145 = vector.shape_cast %144 : vector<1x8x32xf32> to vector<8x32xf32>
    %146 = vector.shape_cast %143 : vector<8x32xf32> to vector<1x8x32xf32>
    tpu.vector_store %arg18[%c0_77, %c0_78, %c0_79], %146 {strides = array<i32>} : memref<1x8x32xf32, #tpu.memory_space<vmem>>, vector<1x8x32xf32>,
    return
  }
  func.func @transform_0(%arg0: i32, %arg1: i32) -> (i32, i32, i32) {
    %c0_i32 = arith.constant 0 : i32
    %c0_i32_0 = arith.constant 0 : i32
    %c0_i32_1 = arith.constant 0 : i32
    return %arg0, %c0_i32, %c0_i32_0 : i32, i32, i32
  }
  func.func @transform_1(%arg0: i32, %arg1: i32) -> (i32, i32, i32) {
    %c0_i32 = arith.constant 0 : i32
    %c0_i32_0 = arith.constant 0 : i32
    return %arg0, %arg1, %c0_i32 : i32, i32, i32
  }
  func.func @transform_2(%arg0: i32, %arg1: i32) -> (i32, i32) {
    %c0_i32 = arith.constant 0 : i32
    %c0_i32_0 = arith.constant 0 : i32
    %c0_i32_1 = arith.constant 0 : i32
    return %c0_i32, %c0_i32_0 : i32, i32
  }
  func.func @transform_3(%arg0: i32, %arg1: i32) -> (i32, i32) {
    %c0_i32 = arith.constant 0 : i32
    %c0_i32_0 = arith.constant 0 : i32
    %c0_i32_1 = arith.constant 0 : i32
    return %c0_i32, %c0_i32_0 : i32, i32
  }
  func.func @transform_4(%arg0: i32, %arg1: i32) -> (i32, i32) {
    %c0_i32 = arith.constant 0 : i32
    %c0_i32_0 = arith.constant 0 : i32
    %c0_i32_1 = arith.constant 0 : i32
    return %c0_i32, %c0_i32_0 : i32, i32
  }
  func.func @transform_5(%arg0: i32, %arg1: i32) -> (i32, i32) {
    %c0_i32 = arith.constant 0 : i32
    %c0_i32_0 = arith.constant 0 : i32
    %c0_i32_1 = arith.constant 0 : i32
    return %c0_i32, %c0_i32_0 : i32, i32
  }
  func.func @transform_6(%arg0: i32, %arg1: i32) -> (i32, i32) {
    %c0_i32 = arith.constant 0 : i32
    %c0_i32_0 = arith.constant 0 : i32
    %c0_i32_1 = arith.constant 0 : i32
    return %c0_i32, %c0_i32_0 : i32, i32
  }
  func.func @transform_7(%arg0: i32, %arg1: i32) -> (i32, i32) {
    %c0_i32 = arith.constant 0 : i32
    %c0_i32_0 = arith.constant 0 : i32
    %c0_i32_1 = arith.constant 0 : i32
    return %c0_i32, %c0_i32_0 : i32, i32
  }
  func.func @transform_8(%arg0: i32, %arg1: i32) -> (i32, i32) {
    %c0_i32 = arith.constant 0 : i32
    %c0_i32_0 = arith.constant 0 : i32
    %c0_i32_1 = arith.constant 0 : i32
    return %c0_i32, %c0_i32_0 : i32, i32
  }
  func.func @transform_9(%arg0: i32, %arg1: i32) -> (i32, i32) {
    %c0_i32 = arith.constant 0 : i32
    %c0_i32_0 = arith.constant 0 : i32
    %c0_i32_1 = arith.constant 0 : i32
    return %c0_i32, %c0_i32_0 : i32, i32
  }
  func.func @transform_10(%arg0: i32, %arg1: i32) -> (i32, i32) {
    %c0_i32 = arith.constant 0 : i32
    %c0_i32_0 = arith.constant 0 : i32
    %c0_i32_1 = arith.constant 0 : i32
    return %c0_i32, %c0_i32_0 : i32, i32
  }
  func.func @transform_11(%arg0: i32, %arg1: i32) -> (i32, i32) {
    %c0_i32 = arith.constant 0 : i32
    %c0_i32_0 = arith.constant 0 : i32
    %c0_i32_1 = arith.constant 0 : i32
    return %c0_i32, %c0_i32_0 : i32, i32
  }
  func.func @transform_12(%arg0: i32, %arg1: i32) -> (i32, i32) {
    %c0_i32 = arith.constant 0 : i32
    %c0_i32_0 = arith.constant 0 : i32
    %c0_i32_1 = arith.constant 0 : i32
    return %c0_i32, %c0_i32_0 : i32, i32
  }
  func.func @transform_13(%arg0: i32, %arg1: i32) -> (i32, i32) {
    %c0_i32 = arith.constant 0 : i32
    %c0_i32_0 = arith.constant 0 : i32
    %c0_i32_1 = arith.constant 0 : i32
    return %c0_i32, %c0_i32_0 : i32, i32
  }
  func.func @transform_14(%arg0: i32, %arg1: i32) -> (i32, i32) {
    %c0_i32 = arith.constant 0 : i32
    %c0_i32_0 = arith.constant 0 : i32
    %c0_i32_1 = arith.constant 0 : i32
    return %c0_i32, %c0_i32_0 : i32, i32
  }
  func.func @transform_15(%arg0: i32, %arg1: i32) -> (i32, i32) {
    %c0_i32 = arith.constant 0 : i32
    %c0_i32_0 = arith.constant 0 : i32
    %c0_i32_1 = arith.constant 0 : i32
    return %c0_i32, %c0_i32_0 : i32, i32
  }
  func.func @transform_16(%arg0: i32, %arg1: i32) -> (i32, i32, i32) {
    %c0_i32 = arith.constant 0 : i32
    %c0_i32_0 = arith.constant 0 : i32
    return %arg0, %arg1, %c0_i32 : i32, i32, i32
  }
  func.func @transform_17(%arg0: i32, %arg1: i32) -> (i32, i32, i32, i32) {
    %c0_i32 = arith.constant 0 : i32
    %c0_i32_0 = arith.constant 0 : i32
    %c0_i32_1 = arith.constant 0 : i32
    return %arg0, %c0_i32, %arg1, %c0_i32_0 : i32, i32, i32, i32
  }
}

</mosaic_0001>

<bundles_post_ra>
// kernel: tpu_custom_call.1
= control target key start
LH: loop header
LB: loop body
LE: loop exit
PB: predicated region body
PF: predicated region fallthrough
CT: control target
= control target key end

     0   :  { %s3009_s0 = inlined_call_operand.vmem [shape: f32[2,8,32], index: 0, kind: input, shape index: {}]   ;;  %s3010_s1 = inlined_call_operand.vmem [shape: f32[2,8,32], index: 1, kind: input, shape index: {}]   ;;  %s3011_s2 = inlined_call_operand.vmem [shape: bf16[32,32], index: 2, kind: input, shape index: {}]   ;;  %s3012_s3 = inlined_call_operand.vmem [shape: f32[1,32], index: 3, kind: input, shape index: {}]   ;;  %s3013_s4 = inlined_call_operand.hbm [shape: bf16[32,64], index: 4, kind: input, shape index: {}]   ;;  %s3014_s5 = inlined_call_operand.vmem [shape: f32[1,64], index: 5, kind: input, shape index: {}]   ;;  %s3015_s6 = inlined_call_operand.hbm [shape: bf16[32,32], index: 6, kind: input, shape index: {}]   ;;  %s3016_s7 = inlined_call_operand.hbm [shape: f32[1,32], index: 7, kind: input, shape index: {}]   ;;  %s3017_s8 = inlined_call_operand.hbm [shape: f32[1,32], index: 8, kind: input, shape index: {}]   ;;  %s3018_s9 = inlined_call_operand.hbm [shape: f32[1,32], index: 9, kind: input, shape index: {}]   ;;  %s3019_s10 = inlined_call_operand.vmem [shape: bf16[32,64], index: 10, kind: input, shape index: {}]   ;;  %s3020_s11 = inlined_call_operand.vmem [shape: f32[1,64], index: 11, kind: input, shape index: {}]   ;;  %s3021_s12 = inlined_call_operand.vmem [shape: bf16[64,32], index: 12, kind: input, shape index: {}]   ;;  %s3022_s13 = inlined_call_operand.vmem [shape: f32[1,32], index: 13, kind: input, shape index: {}]   ;;  %s3023_s14 = inlined_call_operand.vmem [shape: f32[1,32], index: 14, kind: input, shape index: {}]   ;;  %s3024_s15 = inlined_call_operand.vmem [shape: f32[1,32], index: 15, kind: input, shape index: {}]   ;;  %s3025_s16 = inlined_call_operand.hbm [shape: f32[2,8,32], index: 16, kind: output, shape index: {0}]   ;;  %s3026_s17 = inlined_call_operand.hbm [shape: f32[2,4,8,8], index: 17, kind: output, shape index: {1}]  }
   0x1   :  { %3044 = sst [smem:[#allocation31_spill]] %s3009_s0 }
   0x2   :  { %3045 = sst [smem:[#allocation32_spill]] %s3010_s1 }
   0x3   :  { %3046 = sst [smem:[#allocation33_spill]] %s3023_s14 }
   0x4   :  { %3047 = sst [smem:[#allocation34_spill]] %s3024_s15 }
   0x5   :  { %3048 = sst [smem:[#allocation35_spill]] %s3025_s16 }
   0x6   :  { %3049 = sst [smem:[#allocation36_spill]] %s3026_s17 }
   0x7   :  { %23 = vsyncpa [#allocation7], 0 }
   0x8   :  { %24 = vsyncpa [#allocation10], 0 }
   0x9   :  { %25 = vsyncpa [#allocation13], 0 }
   0xa   :  { %26 = vsyncpa [#allocation8], 0 }
   0xb   :  { %28 = vsyncpa [#allocation8 + $0x1], 0 }
   0xc   :  { %29 = vsyncpa [#allocation17], 0 }
   0xd   :  { %31 = vsyncpa [#allocation17 + $0x1], 0  ;;  %s2555_s24 = smov 0   ;;  %s2557_s25 = smov 0  }
   0xe   :  { %s2559_s26 = smov 0   ;;  %s2561_s27 = smov 0  }
   0xf   :  { %s2563_s28 = smov 0   ;;  %s2565_s29 = smov 0  }
  0x10 LB: > { %3050 = sst [smem:[#allocation23_spill]] %s2421_s24  ;;  %s1823_s0 = sadd.s32 4294967295, %s2441_s29   ;;  %s2441_s29 = sphi %s2565_s29, %s37_s29   ;;  %s2437_s28 = sphi %s2563_s28, %s3084_s28   ;;  %s2433_s27 = sphi %s2561_s27, %s3083_s27   ;;  %s2429_s26 = sphi %s2559_s26, %s3082_s26   ;;  %s2425_s25 = sphi %s2557_s25, %s3086_s25   ;;  %s2421_s24 = sphi %s2555_s24, %s3085_s24  }
  0x11   : > { %3051 = sst [smem:[#allocation24_spill]] %s2429_s26  ;;  %s1824_s30 = sadd.s32 4294967294, %s2441_s29  }
  0x12   : > { %3052 = sst [smem:[#allocation25_spill]] %s2437_s28  ;;  %s49_s18 = sadd.s32 1, %s2437_s28 }
  0x13   : > { %3053 = sst [smem:[#allocation26_spill]] %s2441_s29  ;;  %s406_s19 = sadd.s32 1, %s2429_s26 }
  0x14   : > { %p51_p0 = scmp.ge.s32.totalorder %s49_s18, 2  ;;  %p416_p1 = scmp.ne.s32.totalorder %s2429_s26, %s2425_s25 }
  0x15   : > { %p417_p2 = scmp.eq.s32.totalorder %s1823_s0, 1  ;;  %p422_p3 = scmp.ne.s32.totalorder %s2425_s25, %s2421_s24 }
  0x16   : > { %s3088_s18 = smov (%p51_p0, %s49_s18), 0  ;;  %p423_p5 = scmp.eq.s32.totalorder %s1824_s30, 1 }
  0x17   : > { %3054 = sst [smem:[#allocation27_spill]] %s3088_s18  ;;  %p2595_p4 = por %p417_p2, %p416_p1 }
  0x18   : > { %s401_s20 = ssub.s32 %s2437_s28, %s3088_s18  ;;  %p1825_p6 = scmp.ge.s32.totalorder %s2441_s29, 1 }
  0x19   : > { %s3055_s1 = scalar_select %p2595_p4, 1, 0 }
  0x1a   : > { %p404_p7 = scmp.eq.s32.totalorder %s401_s20, 0  ;;  %p2602_p8 = por %p423_p5, %p422_p3 }
  0x1b   : > { %3056 = sst [smem:[#allocation28_spill]] %s3055_s1  ;;  %p458_p9 = scmp.lt.s32.totalorder %s2441_s29, 3 }
  0x1c   : > { %s3057_s21 = scalar_select %p2602_p8, 1, 0 }
  0x1d   : > { %s2608_s22 = scalar_select %p404_p7, %s2429_s26, %s406_s19  }
  0x1e   : > { %3058 = sst [smem:[#allocation29_spill]] %s3057_s21  ;;  %p2610_p10 = pnand %p1825_p6, %p458_p9 }
  0x1f   : > { %3059 = sst [smem:[#allocation30_spill]] %s2608_s22  ;;  %p2614_p11 = scmp.eq.s32.totalorder %s1823_s0, 0 }
  0x20   : > { %s3060_s23 = scalar_select %p2610_p10, 1, 0 }
  0x21   : > { %s3061_s24 = scalar_select %p2614_p11, 1, 0 }
  0x22   : > { %p2043_p12 = pneg %p2610_p10  ;;  %s2443_s30 = smov [#allocation9]  }
  0x23   : > { %s492_s20 = sshll.u32 %s2443_s30, 4  ;;  %s2444_s19 = smov [#allocation12]   ;;  %s493_s20 = int_to_ptr.vmem [resolvable:$true] %s492_s20 }
  0x24   : > { %p2622_p13 = pnand %p2614_p11, %p2043_p12  ;;  %s517_s28 = sshll.u32 %s2444_s19, 4  ;;  %s2626_s28 = int_to_ptr.vmem [resolvable:$true] %s517_s28 }
  0x25   : > { %s2179_s26 = scalar_lea.hbm %s3015_s6, 256 }
  0x26   : > { %p2180_p0 = scmp.ne.s32.totalorder %s3015_s6, %s2179_s26  ;;  %p2636_p1 = pneg %p2622_p13 }
  0x27   : > { %p2186_p5 = scmp.lt.u32.totalorder %s2179_s26, %s3015_s6 }
  0x28   : > { %p2182_p2 = pnand %p2636_p1, %p2180_p0 }
  0x2a   : > { %p2183_p3 = pneg %p2182_p2 }
  0x2c   : > { %p2188_p6 = pnand %p2186_p5, %p2183_p3 }
  0x2e   : > { %2191 = shalt.err (!%p2188_p6)
}
  0x2f   : > { %s2192_s22 = scalar_lea.vmem %s493_s20, 256  ;;  %p2200_p8 = scmp.lt.s32.totalorder %s493_s20, %s493_s20 }
  0x30   : > { %p2193_p7 = scmp.ne.s32.totalorder %s493_s20, %s2192_s22  ;;  %p2201_p4 = scmp.lt.s32.totalorder %s2192_s22, %s2192_s22 }
  0x32   : > { %p2195_p9 = pnand %p2193_p7, %p2636_p1  ;;  %p2202_p11 = por %p2201_p4, %p2200_p8 }
  0x34   : > { %p2196_p12 = pneg %p2195_p9 }
  0x36   : > { %p2203_p10 = pnand %p2202_p11, %p2196_p12 }
  0x38   : > { %2206 = shalt.err (!%p2203_p10)
}
  0x39   : > { %s3042_s29 = smov 64   ;;  %s3043_s21 = smov 4  }
  0x3a   : > { %2049 = dma.hbm_to_vmem [thread:$0]  (!%p2622_p13), %s3015_s6, 256, %s493_s20, [#allocation10], %s3042_s29, %s3042_s29, %s3043_s21  }
  0x3b   : > { %s2207_s15 = scalar_lea.hbm %s3017_s8, 16 }
  0x3c   : > { %p2208_p4 = scmp.ne.s32.totalorder %s3017_s8, %s2207_s15  ;;  %p2214_p11 = scmp.lt.u32.totalorder %s2207_s15, %s3017_s8 }
  0x3e   : > { %p2210_p8 = pnand %p2208_p4, %p2636_p1 }
  0x40   : > { %p2211_p10 = pneg %p2210_p8 }
  0x42   : > { %p2216_p0 = pnand %p2214_p11, %p2211_p10 }
  0x44   : > { %2219 = shalt.err (!%p2216_p0)
}
  0x45   : > { %s2220_s20 = scalar_lea.vmem %s2626_s28, 16  ;;  %s2227_s14 = scalar_lea.vmem %s2626_s28, 32 }
  0x46   : > { %p2221_p2 = scmp.ne.s32.totalorder %s2626_s28, %s2220_s20  ;;  %p2228_p6 = scmp.lt.s32.totalorder %s2626_s28, %s2626_s28 }
  0x47   : > { %p2229_p7 = scmp.lt.s32.totalorder %s2227_s14, %s2220_s20 }
  0x48   : > { %p2223_p3 = pnand %p2221_p2, %p2636_p1 }
  0x49   : > { %p2230_p9 = por %p2229_p7, %p2228_p6 }
  0x4a   : > { %p2224_p5 = pneg %p2223_p3 }
  0x4c   : > { %p2231_p12 = pnand %p2230_p9, %p2224_p5 }
  0x4e   : > { %2234 = shalt.err (!%p2231_p12)
}
  0x4f   : > { %2055 = dma.hbm_to_vmem [thread:$0]  (!%p2622_p13), %s3017_s8, 16, %s2626_s28, [#allocation13]  }
  0x50   : > { %s2447_s1 = smov [#allocation6]   ;;  %s2448_s26 = smov [#allocation11]  }
  0x51   : > { %s476_s16 = sshll.u32 %s2447_s1, 4  ;;  %s506_s0 = sshll.u32 %s2448_s26, 4  ;;  %s477_s16 = int_to_ptr.vmem [resolvable:$true] %s476_s16  ;;  %s507_s0 = int_to_ptr.vmem [resolvable:$true] %s506_s0 }
  0x52   : > { %s2235_s20 = scalar_lea.hbm %s3013_s4, 256 }
  0x53   : > { %p2236_p4 = scmp.ne.s32.totalorder %s3013_s4, %s2235_s20  ;;  %p2242_p11 = scmp.lt.u32.totalorder %s2235_s20, %s3013_s4 }
  0x55   : > { %p2238_p8 = pnand %p2236_p4, %p2636_p1 }
  0x57   : > { %p2239_p10 = pneg %p2238_p8 }
  0x59   : > { %p2244_p0 = pnand %p2242_p11, %p2239_p10 }
  0x5b   : > { %2247 = shalt.err (!%p2244_p0)
}
  0x5c   : > { %s2248_s28 = scalar_lea.vmem %s477_s16, 256  ;;  %p2256_p6 = scmp.lt.s32.totalorder %s477_s16, %s477_s16 }
  0x5d   : > { %p2249_p2 = scmp.ne.s32.totalorder %s477_s16, %s2248_s28  ;;  %p2257_p7 = scmp.lt.s32.totalorder %s2248_s28, %s2248_s28 }
  0x5f   : > { %p2251_p3 = pnand %p2249_p2, %p2636_p1  ;;  %p2258_p9 = por %p2257_p7, %p2256_p6 }
  0x61   : > { %p2252_p5 = pneg %p2251_p3 }
  0x63   : > { %p2259_p12 = pnand %p2258_p9, %p2252_p5 }
  0x65   : > { %2262 = shalt.err (!%p2259_p12)
}
  0x66   : > { %s3064_s29 = smov 4   ;;  %s3065_s17 = smov 64  }
  0x67   : > { %2046 = dma.hbm_to_vmem [thread:$0]  (!%p2622_p13), %s3013_s4, 256, %s477_s16, [#allocation7], %s3065_s17, %s3065_s17, %s3064_s29  }
  0x68   : > { %s2263_s22 = scalar_lea.hbm %s3016_s7, 16 }
  0x69   : > { %p2264_p4 = scmp.ne.s32.totalorder %s3016_s7, %s2263_s22  ;;  %p2270_p11 = scmp.lt.u32.totalorder %s2263_s22, %s3016_s7 }
  0x6b   : > { %p2266_p8 = pnand %p2264_p4, %p2636_p1 }
  0x6d   : > { %p2267_p10 = pneg %p2266_p8 }
  0x6f   : > { %p2272_p0 = pnand %p2270_p11, %p2267_p10 }
  0x71   : > { %2275 = shalt.err (!%p2272_p0)
}
  0x72   : > { %s2276_s21 = scalar_lea.vmem %s507_s0, 16  ;;  %s2283_s16 = scalar_lea.vmem %s507_s0, 32 }
  0x73   : > { %p2277_p2 = scmp.ne.s32.totalorder %s507_s0, %s2276_s21  ;;  %p2284_p6 = scmp.lt.s32.totalorder %s507_s0, %s507_s0 }
  0x74   : > { %p2285_p7 = scmp.lt.s32.totalorder %s2283_s16, %s2276_s21 }
  0x75   : > { %p2279_p3 = pnand %p2277_p2, %p2636_p1 }
  0x76   : > { %p2286_p9 = por %p2285_p7, %p2284_p6 }
  0x77   : > { %p2280_p5 = pneg %p2279_p3 }
  0x79   : > { %p2287_p12 = pnand %p2286_p9, %p2280_p5 }
  0x7b   : > { %2290 = shalt.err (!%p2287_p12)
}
  0x7c   : > { %2052 = dma.hbm_to_vmem [thread:$0]  (!%p2622_p13), %s3016_s7, 16, %s507_s0, [#allocation10]  }
  0x7d   : > { %s2449_s1 = smov [#allocation14]   ;;  %s2291_s20 = scalar_lea.hbm %s3018_s9, 16 }
  0x7e   : > { %s528_s26 = sshll.u32 %s2449_s1, 4  ;;  %p2292_p4 = scmp.ne.s32.totalorder %s3018_s9, %s2291_s20  ;;  %s529_s26 = int_to_ptr.vmem [resolvable:$true] %s528_s26 }
  0x7f   : > { %p2298_p11 = scmp.lt.u32.totalorder %s2291_s20, %s3018_s9 }
  0x80   : > { %p2294_p8 = pnand %p2292_p4, %p2636_p1 }
  0x82   : > { %p2295_p10 = pneg %p2294_p8 }
  0x84   : > { %p2300_p0 = pnand %p2298_p11, %p2295_p10 }
  0x86   : > { %2303 = shalt.err (!%p2300_p0)
}
  0x87   : > { %s2304_s0 = scalar_lea.vmem %s529_s26, 16  ;;  %s2311_s16 = scalar_lea.vmem %s529_s26, 32 }
  0x88   : > { %p2305_p2 = scmp.ne.s32.totalorder %s529_s26, %s2304_s0  ;;  %p2312_p6 = scmp.lt.s32.totalorder %s529_s26, %s529_s26 }
  0x89   : > { %p2313_p7 = scmp.lt.s32.totalorder %s2311_s16, %s2304_s0 }
  0x8a   : > { %p2307_p3 = pnand %p2305_p2, %p2636_p1 }
  0x8b   : > { %p2314_p9 = por %p2313_p7, %p2312_p6 }
  0x8c   : > { %p2308_p5 = pneg %p2307_p3 }
  0x8e   : > { %p2315_p12 = pnand %p2314_p9, %p2308_p5 }
  0x90   : > { %2318 = shalt.err (!%p2315_p12)
}
  0x91   : > { %2058 = dma.hbm_to_vmem [thread:$0]  (!%p2622_p13), %s3018_s9, 16, %s529_s26, [#allocation13]  }
  0x92   : > { %p3066_p4 = scmp.ne.s32.totalorder %s3060_s23, 0 }
  0x93   : > { %p3067_p8 = scmp.ne.s32.totalorder (!%p3066_p4), %s3061_s24, 0 }
  0x94   : > { %576 = sbr.rel (%p3066_p4) target bundleno = 2708 (0xa94), region = 84 }
  0x9b   : > { %2400 = dma.done.wait (%p3067_p8), [#allocation7], 256  }
  0x9c   : > { %2402 = vsyncadd (%p3067_p8), [#allocation7], 4294967040 }
  0x9d   : > { %2404 = dma.done.wait (%p3067_p8), [#allocation10], 272  }
  0x9e   : > { %2406 = vsyncadd (%p3067_p8), [#allocation10], 4294967024 }
  0x9f   : > { %2408 = dma.done.wait (%p3067_p8), [#allocation13], 32  }
  0xa0   : > { %2410 = vsyncadd (%p3067_p8), [#allocation13], 4294967264  ;;  %p655_p13 = scmp.lt.s32.totalorder %s2433_s27, 1  ;;  %v2450_v0 = vmov 0.0   ;;  %vm2451_vm0 = vmmov 0   ;;  %s3068_s1 = sld [smem:[#allocation31_spill]] }
  0xa1   : > { %1927 = vmatprep.subr.bf16.mxu1 %v2450_v0  ;;  %1931 = vmatprep.mubr.msk.bf16.mxu1 %vm2451_vm0, %v2450_v0  ;;  %v2145_v1 = vld [vmem:[#allocation6] sm:$0xff]   ;;  %v2146_v2 = vld [vmem:[#allocation6 + $0x8] sm:$0xff]   ;;  %vm696_vm1 = vcmask 261120   ;;  %s3069_s15 = sld [smem:[#allocation32_spill]]  ;;  %v2148_v7 = vld [vmem:[%s3011_s2 + $0x8] sm:$0xff]   ;;  %vm741_vm2 = vcmask 60416  }
  0xa2   : > { %s656_s18 = scalar_select %p655_p13, %s2433_s27, 1  ;;  %1943 = vmatprep.subr.bf16.mxu0 %v2450_v0  ;;  %1945 = vmatprep.mubr.msk.bf16.mxu0 %vm2451_vm0, %v2450_v0  ;;  %v2147_v4 = vld [vmem:[%s3011_s2] sm:$0xff]   ;;  %vm883_vm3 = vcmask 64512   ;;  %vm1123_vm4 = vcmask 1043456   ;;  %vm1314_vm5 = vcmask 126016   ;;  %vm1323_vm6 = vcmask 191616  }
  0xa3   : > { %1928 = vmatpush3.bf16.msra.mxu1 %v2145_v1  ;;  %v1842_v9 = vld [vmem:[%s3014_s5] ss:$0 sm:$0xff]  ;;  %s2452_s17 = smov 104   ;;  %s2454_s24 = smov 112   ;;  %vm1332_vm7 = vcmask 257216   ;;  %vm1544_vm8 = vcmask 523264  }
  0xa4   : > { %s1840_s23 = sshll.u32 %s656_s18, 3  ;;  %1929 = vmatprep.subr.bf16.mxu1 %v2450_v0  ;;  %s2453_s18 = smov 120   ;;  %v1847_v16 = vld [vmem:[%s3012_s3] ss:$0 sm:$0xff] }
  0xa5   : > { %s2455_s22 = smov 96   ;;  %s2456_s20 = smov 80  }
  0xa6   : > { %s658_s26 = scalar_lea.vmem %s3068_s1, %s1840_s23  ;;  %s2825_s1 = sand.u32 1, %s2425_s25  }
  0xa7   : > { %v671_v3 = vld [vmem:[%s658_s26] sm:$0xff]  ;;  %1930 = vmatpush3.bf16.msra.mxu1 %v2146_v2  ;;  %s665_s28 = scalar_lea.vmem %s3069_s15, %s1840_s23  ;;  %s1839_s26 = sshll.u32 %s2825_s1, 5 }
  0xa8   : > { %v672_v5 = vpack.c.bf16 %v671_v3, %v671_v3  ;;  %1935 = vmatprep.subr.bf16.mxu1 %v2450_v0  ;;  %v2770_v6 = vld [vmem:[%s665_s28] sm:$0xff]  ;;  %s2828_s19 = scalar_lea.vmem [#allocation16], %s1839_s26  ;;  %s2457_s14 = smov 72  }
  0xa9   : > { %v781_v8 = vpack.c.bf16 %v2770_v6, %v2770_v6  ;;  %s2458_s15 = smov 88   ;;  %s2459_s28 = smov 16  }
  0xaa   : > { %1932 = vmatmul.mubr.msk.bf16.vlgmr.msra.gmra.mrb[0].mxu1 %vm696_vm1, %v672_v5  ;;  %s2460_s21 = smov 8   ;;  %s2461_s0 = smov 24  }
  0xab   : > { %1936 = vmatpush3.bf16.msra.mxu1 %v2147_v4  ;;  %1939 = vmatprep.mubr.msk.bf16.mxu1 %vm2451_vm0, %v2450_v0  ;;  %s1893_s23 = sshll.u32 %s2433_s27, 9  ;;  %s3071_s26 = sld [smem:[#allocation36_spill]] }
  0xac   : > { %1937 = vmatprep.subr.bf16.mxu1 %v2450_v0 }
  0xaf   : > { %1938 = vmatpush3.bf16.msra.mxu1 %v2148_v7 }
  0xb0   : > { %1949 = vmatprep.subr.bf16.mxu1 %v2450_v0 }
  0xb2   : > { %1940 = vmatmul.mubr.msk.bf16.vlgmr.msra.gmra.mrb[4].mxu1 %vm696_vm1, %v781_v8 }
  0xb3   : > { %1951 = vmatprep.mubr.msk.bf16.mxu1 %vm2451_vm0, %v2450_v0 }
 0x17d   : > { %v734_v10 = vpop.f32.mrb[0].mxu1 }
 0x17e   : > { %v735_v11 = vadd.f32 %v1842_v9, %v734_v10  ;;  %v1933_v12 = vpop.f32.mrb[1].mxu1 }
 0x17f   : > { %v737_v13 = vpop.f32.mrb[2].mxu1 }
 0x180   : > { %v2787_v14 = vpack.c.bf16 %v735_v11, %v735_v11  ;;  %v1934_v15 = vpop.f32.mrb[3].mxu1 }
 0x182   : > { %742 = vst.msk [vmem:[#allocation2] sm:$0xf] %vm741_vm2, %v2787_v14  ;;  %770 = vrot.lane.b32.xlu1 %v2787_v14, %s2452_s17  ;;  %750 = vrot.lane.b32.xlu0 %v2787_v14, %s2453_s18 }
 0x185   : > { %v843_v17 = vpop.f32.mrb[4].mxu1 }
 0x186   : > { %v844_v18 = vadd.f32 %v1847_v16, %v843_v17  ;;  %760 = vrot.lane.b32.xlu0 %v2787_v14, %s2454_s24  ;;  %v1941_v19 = vpop.f32.mrb[5].mxu1 }
 0x187   : > { %v846_v20 = vpop.f32.mrb[6].mxu1 }
 0x188   : > { %v849_v21 = vmul.f32 0.25, %v844_v18  ;;  %v1942_v22 = vpop.f32.mrb[7].mxu1 }
 0x189   : > { %v875_v23 = vld [vmem:[#allocation2] sm:$0xf] }
 0x18a   : > { %v850_v24 = vpack.c.bf16 %v849_v21, %v849_v21  ;;  %v888_v25 = vsel %vm883_vm3, %v875_v23, 0 }
 0x18b   : > { %1944 = vmatpush3.bf16.xpose.msra.mxu0 %v888_v25 }
 0x18c   : > { %852 = vst.msk [vmem:[#allocation4] sm:$0xf] %vm741_vm2, %v850_v24  ;;  %861 = vrot.lane.b32.xlu0 %v850_v24, %s2454_s24  ;;  %856 = vrot.lane.b32.xlu1 %v850_v24, %s2453_s18  ;;  %s1653_s18 = sshll.u32 %s2828_s19, 4  ;;  %s2916_s18 = int_to_ptr.vmem [resolvable:$true] %s1653_s18 }
 0x18d   : > { %1955 = vmatprep.subr.bf16.mxu0 %v2450_v0 }
 0x190   : > { %866 = vrot.lane.b32.xlu1 %v850_v24, %s2452_s17  ;;  %s3070_s17 = sld [smem:[#allocation28_spill]] }
 0x193   : > { %v871_v26 = vld [vmem:[#allocation4] sm:$0xf] }
 0x194   : > { %1946 = vmatmul.mubr.msk.bf16.vlgmr.msra.gmra.mrb[0].mxu0 %vm883_vm3, %v871_v26 }
 0x195   : > { %1957 = vmatprep.mubr.msk.bf16.mxu0 %vm2451_vm0, %v2450_v0 }
 0x196   : > { %p3073_p10 = scmp.ne.s32.totalorder %s3070_s17, 0 }
 0x1f4   : > { %v771_v27 = vpop.permute.xlu1 %770  ;;  %v751_v28 = vpop.permute.xlu0 %750 }
 0x1f5   : > { %774 = vst.msk [vmem:[#allocation2 + $0xc] sm:$0xf] %vm741_vm2, %v771_v27  ;;  %754 = vst.msk [vmem:[#allocation2 + $0x4] sm:$0xf] %vm741_vm2, %v751_v28 }
 0x1f8   : > { %v761_v29 = vpop.permute.xlu0 %760 }
 0x1f9   : > { %764 = vst.msk [vmem:[#allocation2 + $0x8] sm:$0xf] %vm741_vm2, %v761_v29 }
 0x1fc   : > { %v876_v30 = vld [vmem:[#allocation2 + $0x4] sm:$0xf]  ;;  %v878_v37 = vld [vmem:[#allocation2 + $0xc] sm:$0xf] }
 0x1fd   : > { %v934_v31 = vsel %vm883_vm3, %v876_v30, 0  ;;  %v1026_v39 = vsel %vm883_vm3, %v878_v37, 0 }
 0x1fe   : > { %1950 = vmatpush3.bf16.xpose.msra.mxu1 %v934_v31  ;;  %v862_v32 = vpop.permute.xlu0 %861  ;;  %v857_v33 = vpop.permute.xlu1 %856 }
 0x1ff   : > { %865 = vst.msk [vmem:[#allocation4 + $0x8] sm:$0xf] %vm741_vm2, %v862_v32  ;;  %860 = vst.msk [vmem:[#allocation4 + $0x4] sm:$0xf] %vm741_vm2, %v857_v33  ;;  %1961 = vmatprep.subr.bf16.mxu1 %v2450_v0 }
 0x200   : > { %v877_v34 = vld [vmem:[#allocation2 + $0x8] sm:$0xf] }
 0x201   : > { %v980_v35 = vsel %vm883_vm3, %v877_v34, 0 }
 0x202   : > { %v867_v36 = vpop.permute.xlu1 %866  ;;  %1956 = vmatpush3.bf16.xpose.msra.mxu0 %v980_v35 }
 0x203   : > { %870 = vst.msk [vmem:[#allocation4 + $0xc] sm:$0xf] %vm741_vm2, %v867_v36  ;;  %1967 = vmatprep.subr.bf16.mxu0 %v2450_v0 }
 0x206   : > { %v872_v38 = vld [vmem:[#allocation4 + $0x4] sm:$0xf]  ;;  %v873_v40 = vld [vmem:[#allocation4 + $0x8] sm:$0xf] }
 0x207   : > { %1952 = vmatmul.mubr.msk.bf16.vlgmr.msra.gmra.mrb[8].mxu1 %vm883_vm3, %v872_v38 }
 0x208   : > { %1962 = vmatpush3.bf16.xpose.msra.mxu1 %v1026_v39  ;;  %1963 = vmatprep.mubr.msk.bf16.mxu1 %vm2451_vm0, %v2450_v0 }
 0x209   : > { %1958 = vmatmul.mubr.msk.bf16.vlgmr.msra.gmra.mrb[4].mxu0 %vm883_vm3, %v873_v40  ;;  %1973 = vmatprep.subr.bf16.mxu1 %v2450_v0 }
 0x20a   : > { %1969 = vmatprep.mubr.msk.bf16.mxu0 %vm2451_vm0, %v2450_v0  ;;  %v874_v41 = vld [vmem:[#allocation4 + $0xc] sm:$0xf] }
 0x20f   : > { %1964 = vmatmul.mubr.msk.bf16.vlgmr.msra.gmra.mrb[12].mxu1 %vm883_vm3, %v874_v41 }
 0x210   : > { %1975 = vmatprep.mubr.msk.bf16.mxu1 %vm2451_vm0, %v2450_v0 }
 0x267   : > { %v924_v42 = vpop.f32.mrb[0].mxu0 }
 0x268   : > { %1068 = vst.msk [vmem:[%s2828_s19] sm:$0xff] %vm883_vm3, %v924_v42  ;;  %v1947_v43 = vpop.f32.mrb[1].mxu0  ;;  %v1072_v44 = vsel %vm883_vm3, %v924_v42, -inf }
 0x269   : > { %1073 = vmax.xlane.f32.xlu0 %v1072_v44  ;;  %v927_v45 = vpop.f32.mrb[2].mxu0 }
 0x26a   : > { %v1948_v46 = vpop.f32.mrb[3].mxu0 }
 0x2da   : > { %v970_v47 = vpop.f32.mrb[8].mxu1 }
 0x2db   : > { %1069 = vst.msk [vmem:[%s2828_s19 + $0x8] sm:$0xff] %vm883_vm3, %v970_v47  ;;  %v1953_v48 = vpop.f32.mrb[9].mxu1  ;;  %v1075_v49 = vsel %vm883_vm3, %v970_v47, -inf }
 0x2dc   : > { %v1016_v50 = vpop.f32.mrb[4].mxu0  ;;  %1076 = vmax.xlane.f32.xlu1 %v1075_v49  ;;  %v973_v51 = vpop.f32.mrb[10].mxu1 }
 0x2dd   : > { %1070 = vst.msk [vmem:[%s2828_s19 + $0x10] sm:$0xff] %vm883_vm3, %v1016_v50  ;;  %v1954_v52 = vpop.f32.mrb[11].mxu1  ;;  %v1959_v53 = vpop.f32.mrb[5].mxu0  ;;  %v1078_v54 = vsel %vm883_vm3, %v1016_v50, -inf }
 0x2de   : > { %1079 = vmax.xlane.f32.xlu0 %v1078_v54  ;;  %v1019_v55 = vpop.f32.mrb[6].mxu0 }
 0x2df   : > { %v1960_v56 = vpop.f32.mrb[7].mxu0 }
 0x2e2   : > { %v1062_v57 = vpop.f32.mrb[12].mxu1 }
 0x2e3   : > { %1071 = vst.msk [vmem:[%s2828_s19 + $0x18] sm:$0xff] %vm883_vm3, %v1062_v57  ;;  %v1965_v58 = vpop.f32.mrb[13].mxu1  ;;  %v1081_v59 = vsel %vm883_vm3, %v1062_v57, -inf }
 0x2e4   : > { %1082 = vmax.xlane.f32.xlu0 %v1081_v59  ;;  %v1065_v60 = vpop.f32.mrb[14].mxu1  ;;  %v2149_v58 = vld [vmem:[#allocation9] sm:$0xff]  }
 0x2e5   : > { %v1966_v61 = vpop.f32.mrb[15].mxu1  ;;  %v2150_v60 = vld [vmem:[#allocation9 + $0x8] sm:$0xff]  }
 0x2ed   : > { %746 = vrot.lane.b32.xlu1 %v2787_v14, %s2455_s22  ;;  %s3072_s22 = smov %s3071_s26 }
 0x2f6   : > { %v1074_v62 = vpop.xlane.xlu0 %1073 }
 0x2f7   : > { %v1084_v63 = vsub.f32 %v924_v42, %v1074_v62 }
 0x2f9   : > { %v1088_v1 = vmul.f32 1.442695, %v1084_v63 }
 0x2fb   : > { %2157 = vpow2.f32 %v1088_v1 }
 0x305   : > { %v2158_v2 = vpop.eup %2157 }
 0x306   : > { %v1096_v3 = vsel %vm883_vm3, %v2158_v2, 0.0 }
 0x311   : > { %1097 = vadd.xlane.f32.xlu1 %v1096_v3 }
 0x369   : > { %v1077_v4 = vpop.xlane.xlu1 %1076 }
 0x36a   : > { %v1085_v5 = vsub.f32 %v970_v47, %v1077_v4 }
 0x36b   : > { %v1080_v7 = vpop.xlane.xlu0 %1079 }
 0x36c   : > { %v1090_v8 = vmul.f32 1.442695, %v1085_v5  ;;  %v1086_v9 = vsub.f32 %v1016_v50, %v1080_v7 }
 0x36d   : > { %v747_v10 = vpop.permute.xlu1 %746 }
 0x36e   : > { %2159 = vpow2.f32 %v1090_v8  ;;  %v1092_v11 = vmul.f32 1.442695, %v1086_v9  ;;  %749 = vst.msk [vmem:[#allocation3] sm:$0xf] %vm741_vm2, %v747_v10 }
 0x370   : > { %2161 = vpow2.f32 %v1092_v11 }
 0x371   : > { %v1083_v12 = vpop.xlane.xlu0 %1082 }
 0x372   : > { %v1087_v13 = vsub.f32 %v1062_v57, %v1083_v12  ;;  %v1863_v12 = vld [vmem:[#allocation11] ss:$0 sm:$0xff] }
 0x374   : > { %v1094_v15 = vmul.f32 1.442695, %v1087_v13 }
 0x375   : > { %v879_v16 = vld [vmem:[#allocation3] sm:$0xf] }
 0x376   : > { %2163 = vpow2.f32 %v1094_v15  ;;  %v1125_v17 = vsel %vm1123_vm4, %v879_v16, 0 }
 0x377   : > { %1968 = vmatpush3.bf16.msra.mxu0 %v1125_v17 }
 0x378   : > { %v2160_v18 = vpop.eup %2159  ;;  %1979 = vmatprep.subr.bf16.mxu0 %v2450_v0 }
 0x379   : > { %v1099_v19 = vsel %vm883_vm3, %v2160_v18, 0.0 }
 0x37a   : > { %v2162_v20 = vpop.eup %2161  ;;  %1100 = vadd.xlane.f32.xlu0 %v1099_v19 }
 0x37b   : > { %v1102_v21 = vsel %vm883_vm3, %v2162_v20, 0.0 }
 0x37c   : > { %1103 = vadd.xlane.f32.xlu1 %v1102_v21 }
 0x380   : > { %v2164_v22 = vpop.eup %2163 }
 0x381   : > { %v1105_v23 = vsel %vm883_vm3, %v2164_v22, 0.0 }
 0x382   : > { %1106 = vadd.xlane.f32.xlu0 %v1105_v23 }
 0x38d   : > { %765 = vrot.lane.b32.xlu1 %v2787_v14, %s2456_s20  ;;  %s2922_s20 = scalar_lea.hbm %s3071_s26, %s1893_s23 }
 0x391   : > { %775 = vrot.lane.b32.xlu1 %v2787_v14, %s2457_s14  ;;  %s1625_s14 = scalar_lea.sflag [#allocation17], %s2825_s1 }
 0x398   : > { %755 = vrot.lane.b32.xlu0 %v2787_v14, %s2458_s15  ;;  %s2319_s15 = scalar_lea.vmem %s2916_s18, 512 }
 0x399   : > { %p2320_p1 = scmp.ne.s32.totalorder %s2916_s18, %s2319_s15 }
 0x39b   : > { %p2321_p11 = pnand %p2320_p1, %p3073_p10 }
 0x39d   : > { %p2322_p0 = pneg %p2321_p11 }
 0x39e   : > { %v1098_v24 = vpop.xlane.xlu1 %1097 }
 0x39f   : > { %2165 = vrcp.f32 %v1098_v24 }
 0x3a9   : > { %v2166_v25 = vpop.eup %2165 }
 0x3aa   : > { %v1112_v26 = vmul.f32 %v2166_v25, %v2158_v2 }
 0x3ac   : > { %v1116_v27 = vpack.c.bf16 %v1112_v26, %v1112_v26  ;;  %v2151_v26 = vld [vmem:[%s3019_s10] sm:$0xff]  }
 0x3ae   : > { %1970 = vmatmul.mubr.msk.bf16.vlgmr.msra.gmra.mrb[8].mxu0 %vm883_vm3, %v1116_v27  ;;  %v2152_v27 = vld [vmem:[%s3019_s10 + $0x8] sm:$0xff]  }
 0x3af   : > { %1981 = vmatprep.mubr.msk.bf16.mxu0 %vm2451_vm0, %v2450_v0 }
 0x407   : > { %v1101_v29 = vpop.xlane.xlu0 %1100 }
 0x409   : > { %v1104_v28 = vpop.xlane.xlu1 %1103 }
 0x40a   : > { %2167 = vrcp.f32 %v1104_v28 }
 0x40b   : > { %2169 = vrcp.f32 %v1101_v29 }
 0x40d   : > { %v766_v30 = vpop.permute.xlu1 %765 }
 0x40e   : > { %769 = vst.msk [vmem:[#allocation3 + $0x8] sm:$0xf] %vm741_vm2, %v766_v30 }
 0x40f   : > { %v1107_v31 = vpop.xlane.xlu0 %1106 }
 0x410   : > { %2171 = vrcp.f32 %v1107_v31  ;;  %v1867_v31 = vld [vmem:[#allocation12] ss:$0 sm:$0xff] }
 0x411   : > { %v776_v32 = vpop.permute.xlu1 %775 }
 0x412   : > { %779 = vst.msk [vmem:[#allocation3 + $0xc] sm:$0xf] %vm741_vm2, %v776_v32 }
 0x413   : > { %v756_v14 = vpop.permute.xlu0 %755 }
 0x414   : > { %v2168_v33 = vpop.eup %2167  ;;  %759 = vst.msk [vmem:[#allocation3 + $0x4] sm:$0xf] %vm741_vm2, %v756_v14  ;;  %v1868_v14 = vld [vmem:[#allocation14] ss:$0 sm:$0xff] }
 0x415   : > { %v1114_v34 = vmul.f32 %v2168_v33, %v2162_v20  ;;  %v881_v35 = vld [vmem:[#allocation3 + $0x8] sm:$0xf]  ;;  %v2170_v37 = vpop.eup %2169 }
 0x416   : > { %v1217_v36 = vsel %vm1123_vm4, %v881_v35, 0  ;;  %v1113_v39 = vmul.f32 %v2170_v37, %v2160_v18  ;;  %v2154_v37 = vld [vmem:[%s3021_s12 + $0x8] sm:$0xff]  }
 0x417   : > { %1980 = vmatpush3.bf16.msra.mxu0 %v1217_v36  ;;  %v1118_v38 = vpack.c.bf16 %v1114_v34, %v1114_v34  ;;  %v2153_v36 = vld [vmem:[%s3021_s12] sm:$0xff]  }
 0x418   : > { %1991 = vmatprep.subr.bf16.mxu0 %v2450_v0  ;;  %v1117_v43 = vpack.c.bf16 %v1113_v39, %v1113_v39  ;;  %v2156_v39 = vld [vmem:[%s3021_s12 + $0x18] sm:$0xff]  }
 0x419   : > { %v882_v42 = vld [vmem:[#allocation3 + $0xc] sm:$0xf] }
 0x41a   : > { %1982 = vmatmul.mubr.msk.bf16.vlgmr.msra.gmra.mrb[12].mxu0 %vm883_vm3, %v1118_v38  ;;  %v2172_v44 = vpop.eup %2171  ;;  %v1263_v45 = vsel %vm1123_vm4, %v882_v42, 0  ;;  %v2155_v38 = vld [vmem:[%s3021_s12 + $0x10] sm:$0xff]  }
 0x41b   : > { %v880_v40 = vld [vmem:[#allocation3 + $0x4] sm:$0xf]  ;;  %1995 = vmatprep.mubr.msk.bf16.mxu0 %vm2451_vm0, %v2450_v0  ;;  %v1115_v46 = vmul.f32 %v2172_v44, %v2164_v22  ;;  %1992 = vmatpush3.bf16.msra.mxu0 %v2149_v58 }
 0x41c   : > { %v1171_v41 = vsel %vm1123_vm4, %v880_v40, 0  ;;  %1993 = vmatprep.subr.bf16.mxu0 %v2450_v0  ;;  %v1869_v40 = vld [vmem:[%s3020_s11] ss:$0 sm:$0xff] }
 0x41d   : > { %1974 = vmatpush3.bf16.msra.mxu1 %v1171_v41  ;;  %v1119_v47 = vpack.c.bf16 %v1115_v46, %v1115_v46 }
 0x41e   : > { %1985 = vmatprep.subr.bf16.mxu1 %v2450_v0 }
 0x41f   : > { %1994 = vmatpush3.bf16.msra.mxu0 %v2150_v60 }
 0x420   : > { %1976 = vmatmul.mubr.msk.bf16.vlgmr.msra.gmra.mrb[16].mxu1 %vm883_vm3, %v1117_v43  ;;  %2007 = vmatprep.subr.bf16.mxu0 %v2450_v0 }
 0x421   : > { %1986 = vmatpush3.bf16.msra.mxu1 %v1263_v45  ;;  %1987 = vmatprep.mubr.msk.bf16.mxu1 %vm2451_vm0, %v2450_v0 }
 0x422   : > { %1999 = vmatprep.subr.bf16.mxu1 %v2450_v0 }
 0x428   : > { %1988 = vmatmul.mubr.msk.bf16.vlgmr.msra.gmra.mrb[20].mxu1 %vm883_vm3, %v1119_v47 }
 0x429   : > { %2003 = vmatprep.mubr.msk.bf16.mxu1 %vm2451_vm0, %v2450_v0  ;;  %2000 = vmatpush3.bf16.msra.mxu1 %v2151_v26 }
 0x42a   : > { %2001 = vmatprep.subr.bf16.mxu1 %v2450_v0 }
 0x42d   : > { %2002 = vmatpush3.bf16.msra.mxu1 %v2152_v27 }
 0x481   : > { %v1161_v48 = vpop.f32.mrb[8].mxu0 }
 0x482   : > { %v1305_v49 = vpack.c.bf16 %v1161_v48, %v1161_v48  ;;  %v1971_v50 = vpop.f32.mrb[9].mxu0 }
 0x483   : > { %v1164_v51 = vpop.f32.mrb[10].mxu0 }
 0x484   : > { %1306 = vst.msk [vmem:[#allocation5] sm:$0xf] %vm741_vm2, %v1305_v49  ;;  %v1972_v52 = vpop.f32.mrb[11].mxu0  ;;  %v1873_v51 = vld [vmem:[%s3022_s13] ss:$0 sm:$0xff] }
 0x4ed   : > { %v1253_v53 = vpop.f32.mrb[12].mxu0 }
 0x4ee   : > { %v1891_v54 = vpack.c.bf16 %v1253_v53, %v1253_v53  ;;  %v1983_v55 = vpop.f32.mrb[13].mxu0 }
 0x4ef   : > { %v1256_v56 = vpop.f32.mrb[14].mxu0 }
 0x4f0   : > { %1320 = vrot.lane.b32.xlu1 %v1891_v54, %s2459_s28  ;;  %v1984_v57 = vpop.f32.mrb[15].mxu0  ;;  %s2462_s28 = smov [#allocation16]  }
 0x4f3   : > { %v1207_v59 = vpop.f32.mrb[16].mxu1 }
 0x4f4   : > { %v1890_v61 = vpack.c.bf16 %v1207_v59, %v1207_v59  ;;  %v1977_v62 = vpop.f32.mrb[17].mxu1 }
 0x4f5   : > { %v1210_v63 = vpop.f32.mrb[18].mxu1 }
 0x4f6   : > { %1311 = vrot.lane.b32.xlu0 %v1890_v61, %s2460_s21  ;;  %v1978_v1 = vpop.f32.mrb[19].mxu1 }
 0x4fb   : > { %v1299_v2 = vpop.f32.mrb[20].mxu1 }
 0x4fc   : > { %v1892_v3 = vpack.c.bf16 %v1299_v2, %v1299_v2  ;;  %v1989_v4 = vpop.f32.mrb[21].mxu1 }
 0x4fd   : > { %v1302_v5 = vpop.f32.mrb[22].mxu1 }
 0x4fe   : > { %1329 = vrot.lane.b32.xlu0 %v1892_v3, %s2461_s0  ;;  %v1990_v7 = vpop.f32.mrb[23].mxu1  ;;  %s2323_s0 = sshll.u32 %s2462_s28, 4  ;;  %s2324_s0 = int_to_ptr.vmem [resolvable:$false] %s2323_s0 }
 0x4ff   : > { %s2325_s19 = scalar_lea.vmem %s2324_s0, 1024  ;;  %p2326_p2 = scmp.lt.s32.totalorder %s2916_s18, %s2324_s0 }
 0x500   : > { %p2327_p3 = scmp.lt.s32.totalorder %s2325_s19, %s2319_s15 }
 0x502   : > { %p2328_p5 = por %p2327_p3, %p2326_p2 }
 0x504   : > { %p2329_p6 = pnand %p2328_p5, %p2322_p0 }
 0x562   : > { %v1321_v9 = vpop.permute.xlu1 %1320 }
 0x568   : > { %v1312_v8 = vpop.permute.xlu0 %1311 }
 0x569   : > { %1315 = vst.msk [vmem:[#allocation5] sm:$0xf] %vm1314_vm5, %v1312_v8 }
 0x56a   : > { %1324 = vst.msk [vmem:[#allocation5] sm:$0xf] %vm1323_vm6, %v1321_v9 }
 0x570   : > { %v1330_v10 = vpop.permute.xlu0 %1329 }
 0x571   : > { %1333 = vst.msk [vmem:[#allocation5] sm:$0xf] %vm1332_vm7, %v1330_v10 }
 0x578   : > { %v1334_v11 = vld [vmem:[#allocation5] sm:$0xf] }
 0x579   : > { %1996 = vmatmul.mubr.msk.bf16.vlgmr.msra.gmra.mrb[16].mxu0 %vm696_vm1, %v1334_v11 }
 0x57a   : > { %2015 = vmatprep.mubr.msk.bf16.mxu0 %vm2451_vm0, %v2450_v0  ;;  %2008 = vmatpush3.bf16.msra.mxu0 %v2153_v36 }
 0x57b   : > { %2009 = vmatprep.subr.bf16.mxu0 %v2450_v0 }
 0x57e   : > { %2010 = vmatpush3.bf16.msra.mxu0 %v2154_v37 }
 0x57f   : > { %2011 = vmatprep.subr.bf16.mxu0 %v2450_v0 }
 0x582   : > { %2012 = vmatpush3.bf16.msra.mxu0 %v2155_v38 }
 0x583   : > { %2013 = vmatprep.subr.bf16.mxu0 %v2450_v0 }
 0x586   : > { %2014 = vmatpush3.bf16.msra.mxu0 %v2156_v39 }
 0x64c   : > { %v1395_v13 = vpop.f32.mrb[16].mxu0 }
 0x64d   : > { %v1396_v15 = vadd.f32 %v1863_v12, %v1395_v13  ;;  %v1997_v16 = vpop.f32.mrb[17].mxu0 }
 0x64e   : > { %v1398_v17 = vpop.f32.mrb[18].mxu0 }
 0x64f   : > { %v1998_v18 = vpop.f32.mrb[19].mxu0  ;;  %v1401_v19 = vadd.f32 %v1396_v15, %v2770_v6 }
 0x651   : > { %v1404_v20 = vsel %vm696_vm1, %v1401_v19, 0.0 }
 0x652   : > { %1405 = vadd.xlane.f32.xlu1 %v1404_v20 }
 0x6df   : > { %v1406_v21 = vpop.xlane.xlu1 %1405 }
 0x6e0   : > { %v1408_v22 = vmul.f32 0.03125, %v1406_v21 }
 0x6e2   : > { %v1409_v23 = vsub.f32 %v1401_v19, %v1408_v22 }
 0x6e4   : > { %v1410_v24 = vmul.f32 %v1409_v23, %v1409_v23 }
 0x6e6   : > { %v1411_v25 = vsel %vm696_vm1, %v1410_v24, 0.0 }
 0x6e7   : > { %1412 = vadd.xlane.f32.xlu0 %v1411_v25 }
 0x774   : > { %v1413_v6 = vpop.xlane.xlu0 %1412 }
 0x775   : > { %v1414_v28 = vmul.f32 0.03125, %v1413_v6 }
 0x777   : > { %v1415_v29 = vadd.f32 1e-05, %v1414_v28 }
 0x779   : > { %2173 = vrsqrt.f32 %v1415_v29 }
 0x783   : > { %v2174_v30 = vpop.eup %2173 }
 0x784   : > { %v1417_v32 = vmul.f32 %v2174_v30, %v1409_v23 }
 0x786   : > { %v1424_v33 = vmul.f32 %v1867_v31, %v1417_v32 }
 0x788   : > { %v1431_v34 = vadd.f32 %v1868_v14, %v1424_v33 }
 0x78a   : > { %v1432_v35 = vpack.c.bf16 %v1431_v34, %v1431_v34 }
 0x78c   : > { %2004 = vmatmul.mubr.msk.bf16.vlgmr.msra.gmra.mrb[24].mxu1 %vm696_vm1, %v1432_v35 }
 0x85f   : > { %v1493_v41 = vpop.f32.mrb[24].mxu1 }
 0x860   : > { %v1494_v42 = vadd.f32 %v1869_v40, %v1493_v41  ;;  %v2005_v43 = vpop.f32.mrb[25].mxu1 }
 0x861   : > { %v1496_v44 = vpop.f32.mrb[26].mxu1 }
 0x862   : > { %v1500_v45 = vmul.f32 0.70710677, %v1494_v42  ;;  %v2006_v46 = vpop.f32.mrb[27].mxu1  ;;  %v1499_v48 = vmul.f32 0.5, %v1494_v42 }
 0x864   : > { %2175 = verf.f32 %v1500_v45 }
 0x86e   : > { %v2176_v47 = vpop.eup %2175 }
 0x86f   : > { %v1502_v49 = vadd.f32 1.0, %v2176_v47 }
 0x871   : > { %v1503_v0 = vmul.f32 %v1502_v49, %v1499_v48 }
 0x873   : > { %v1504_v50 = vpack.c.bf16 %v1503_v0, %v1503_v0 }
 0x875   : > { %2016 = vmatmul.mubr.msk.bf16.vlgmr.msra.gmra.mrb[20].mxu0 %vm1544_vm8, %v1504_v50 }
 0x948   : > { %v1582_v52 = vpop.f32.mrb[20].mxu0 }
 0x949   : > { %v1583_v53 = vadd.f32 %v1873_v51, %v1582_v52  ;;  %v2017_v54 = vpop.f32.mrb[21].mxu0 }
 0x94a   : > { %v1585_v55 = vpop.f32.mrb[22].mxu0 }
 0x94b   : > { %v2018_v56 = vpop.f32.mrb[23].mxu0  ;;  %v1588_v57 = vadd.f32 %v1583_v53, %v1431_v34 }
 0x94d   : > { %v1591_v58 = vsel %vm696_vm1, %v1588_v57, 0.0 }
 0x94e   : > { %1592 = vadd.xlane.f32.xlu0 %v1591_v58 }
 0x9db   : > { %v1593_v59 = vpop.xlane.xlu0 %1592 }
 0x9dc   : > { %v1594_v60 = vmul.f32 0.03125, %v1593_v59 }
 0x9de   : > { %v1595_v61 = vsub.f32 %v1588_v57, %v1594_v60 }
 0x9e0   : > { %v1596_v62 = vmul.f32 %v1595_v61, %v1595_v61 }
 0x9e2   : > { %v1597_v63 = vsel %vm696_vm1, %v1596_v62, 0.0 }
 0x9e3   : > { %1598 = vadd.xlane.f32.xlu1 %v1597_v63 }
 0x9e4   : > { %2332 = shalt.err (!%p2329_p6)
}
 0x9e5   : > { %s2333_s16 = scalar_lea.hbm %s2922_s20, 512  ;;  %s2337_s30 = scalar_lea.hbm %s3072_s22, 1024 }
 0x9e6   : > { %p2334_p7 = scmp.ne.s32.totalorder %s2922_s20, %s2333_s16  ;;  %p2338_p4 = scmp.lt.u32.totalorder %s2922_s20, %s3072_s22 }
 0x9e7   : > { %p2339_p8 = scmp.lt.u32.totalorder %s2337_s30, %s2333_s16  ;;  %p2341_p1 = scmp.lt.u32.totalorder %s2333_s16, %s2922_s20 }
 0x9e8   : > { %p2335_p9 = pnand %p2334_p7, %p3073_p10 }
 0x9e9   : > { %p2340_p13 = por %p2339_p8, %p2338_p4 }
 0x9ea   : > { %p2336_p12 = pneg %p2335_p9 }
 0x9eb   : > { %p2342_p11 = por %p2341_p1, %p2340_p13 }
 0x9ed   : > { %p2343_p0 = pnand %p2342_p11, %p2336_p12 }
 0x9ef   : > { %2346 = shalt.err (!%p2343_p0)
}
 0x9f0   : > { %s2463_s15 = smov 128   ;;  %s1838_s28 = sshll.u32 %s2825_s1, 3 }
 0x9f1   : > { %2040 = dma.vmem_to_hbm [thread:$0]  (%p3073_p10), %s2916_s18, 512, %s2922_s20, %s1625_s14, %s2463_s15, %s2463_s15, %s2460_s21  }
 0x9f2   : > { %s3074_s16 = sld [smem:[#allocation33_spill]]  ;;  %s3075_s30 = sld [smem:[#allocation34_spill]] }
 0x9f3   : > { %s1883_s24 = sshll.u32 %s2433_s27, 7  ;;  %s647_s26 = scalar_lea.vmem [#allocation15], %s1838_s28 }
 0x9f4   : > { %s1639_s21 = sshll.u32 %s647_s26, 4  ;;  %s3076_s14 = sld [smem:[#allocation35_spill]]  ;;  %s2962_s21 = int_to_ptr.vmem [resolvable:$true] %s1639_s21 }
 0x9f5   : > { %s1620_s0 = scalar_lea.sflag [#allocation8], %s2825_s1  ;;  %s2347_s19 = scalar_lea.vmem %s2962_s21, 128 }
 0x9f6   : > { %p2348_p2 = scmp.ne.s32.totalorder %s2962_s21, %s2347_s19  ;;  %s2464_s27 = smov [#allocation15]  }
 0x9f7   : > { %s2351_s28 = sshll.u32 %s2464_s27, 4  ;;  %s2352_s28 = int_to_ptr.vmem [resolvable:$false] %s2351_s28 }
 0x9f8   : > { %v1879_v5 = vld [vmem:[%s3074_s16] ss:$0 sm:$0xff]  ;;  %p2349_p3 = pnand %p2348_p2, %p3073_p10  ;;  %s2353_s16 = scalar_lea.vmem %s2352_s28, 256 }
 0x9f9   : > { %v1880_v8 = vld [vmem:[%s3075_s30] ss:$0 sm:$0xff]  ;;  %p2354_p6 = scmp.lt.s32.totalorder %s2962_s21, %s2352_s28  ;;  %p2355_p7 = scmp.lt.s32.totalorder %s2353_s16, %s2347_s19 }
 0x9fa   : > { %s2960_s15 = scalar_lea.hbm %s3076_s14, %s1883_s24  ;;  %p2350_p5 = pneg %p2349_p3 }
 0x9fb   : > { %p2356_p9 = por %p2355_p7, %p2354_p6 }
 0x9fd   : > { %p2357_p12 = pnand %p2356_p9, %p2350_p5 }
 0xa70   : > { %v1599_v1 = vpop.xlane.xlu1 %1598 }
 0xa71   : > { %v1600_v2 = vmul.f32 0.03125, %v1599_v1 }
 0xa73   : > { %v1601_v3 = vadd.f32 1e-05, %v1600_v2 }
 0xa75   : > { %2177 = vrsqrt.f32 %v1601_v3 }
 0xa7f   : > { %v2178_v4 = vpop.eup %2177 }
 0xa80   : > { %v1603_v7 = vmul.f32 %v2178_v4, %v1595_v61 }
 0xa82   : > { %v1610_v9 = vmul.f32 %v1879_v5, %v1603_v7 }
 0xa84   : > { %v1617_v10 = vadd.f32 %v1880_v8, %v1610_v9 }
 0xa86   : > { %1618 = vst.msk [vmem:[%s647_s26] sm:$0xff] %vm696_vm1, %v1617_v10 }
 0xa87   : > { %2360 = shalt.err (!%p2357_p12)
}
 0xa88   : > { %s2361_s1 = scalar_lea.hbm %s2960_s15, 128  ;;  %s2365_s30 = scalar_lea.hbm %s3076_s14, 256 }
 0xa89   : > { %p2362_p4 = scmp.ne.s32.totalorder %s2960_s15, %s2361_s1  ;;  %p2366_p1 = scmp.lt.u32.totalorder %s2960_s15, %s3076_s14 }
 0xa8a   : > { %p2367_p11 = scmp.lt.u32.totalorder %s2365_s30, %s2361_s1  ;;  %p2369_p2 = scmp.lt.u32.totalorder %s2361_s1, %s2960_s15 }
 0xa8b   : > { %p2363_p8 = pnand %p2362_p4, %p3073_p10 }
 0xa8c   : > { %p2368_p0 = por %p2367_p11, %p2366_p1 }
 0xa8d   : > { %p2364_p13 = pneg %p2363_p8 }
 0xa8e   : > { %p2370_p3 = por %p2369_p2, %p2368_p0 }
 0xa90   : > { %p2371_p5 = pnand %p2370_p3, %p2364_p13 }
 0xa92   : > { %2374 = shalt.err (!%p2371_p5)
}
 0xa93   : > { %2039 = dma.vmem_to_hbm [thread:$0]  (%p3073_p10), %s2962_s21, 128, %s2960_s15, %s1620_s0  }
 0xa94 PF: > { %s3077_s18 = sld [smem:[#allocation26_spill]]  ;;  %s3078_s20 = sld [smem:[#allocation23_spill]] }
 0xa95   : > { %s3079_s19 = sld [smem:[#allocation29_spill]] }
 0xa9a   : > { %p2076_p6 = scmp.ge.s32.totalorder %s3077_s18, 2  ;;  %s1668_s27 = sand.u32 1, %s3078_s20  }
 0xa9b   : > { %p3080_p7 = scmp.ne.s32.totalorder %s3079_s19, 0  ;;  %s1669_s28 = scalar_lea.sflag [#allocation8], %s1668_s27 }
 0xa9d   : > { %p2060_p9 = pnand %p2076_p6, %p3080_p7 }
 0xa9f   : > { %2412 = dma.done.wait (!%p2060_p9), %s1669_s28, 128  }
 0xaa0   : > { %2414 = vsyncadd (!%p2060_p9), %s1669_s28, 4294967168  ;;  %s1678_s16 = scalar_lea.sflag [#allocation17], %s1668_s27 }
 0xaa1   : > { %2416 = dma.done.wait (!%p2060_p9), %s1678_s16, 512  }
 0xaa2   : > { %2418 = vsyncadd (!%p2060_p9), %s1678_s16, 4294966784  ;;  %s37_s29 = sadd.s32 1, %s3077_s18   ;;  %s3081_s17 = sld [smem:[#allocation24_spill]] }
 0xaa3   : > { %p34_p12 = scmp.ge.s32.totalorder %s37_s29, 4   ;;  %s3082_s26 = sld [smem:[#allocation30_spill]] }
 0xaa4   : > { %s3083_s27 = sld [smem:[#allocation25_spill]]  ;;  %s3084_s28 = sld [smem:[#allocation27_spill]] }
 0xaa5   : > { %s3085_s24 = smov %s2425_s25  ;;  %36 = sbr.rel (!%p34_p12) target bundleno = 16 (0x10), region = 173 }
 0xaa8   : > { %s3086_s25 = smov %s3081_s17 }
 0xaac   :  { %1683 = vsyncpa [#allocation7], 1 }
 0xaad   :  { %1685 = vsyncpa [#allocation7 + $0x1], 1 }
 0xaae   :  { %1686 = vsyncpa [#allocation10], 1 }
 0xaaf   :  { %1687 = vsyncpa [#allocation13], 1 }
 0xab0   :  { %1688 = vsyncpa [#allocation8], 1 }
 0xab1   :  { %1690 = vsyncpa [#allocation8 + $0x1], 1 }
 0xab2   :  { %1691 = vsyncpa [#allocation17], 1 }
 0xab3   :  { %1693 = vsyncpa [#allocation17 + $0x1], 1 }

</bundles_post_ra>
